<compile_context>
chip_gen: v5e
topology: v5e:2x2
jax: 0.10.0
libtpu: 0.0.40
codegen_flags: <defaults>
</compile_context>

<pallas_src>
import jax
import jax.numpy as jnp
from jax.experimental import pallas as pl
from jax.experimental.pallas import tpu as pltpu

NEG_INF = -1e30  # additive mask value for non-edges


def _gelu_tanh(x):
    # TODO(synk): PyTorch nn.GELU default is the exact erf form; the tanh
    # approximation (diff ~1e-3) is used for guaranteed EUP lowering. The
    # reference below uses the same form.
    c = 0.7978845608028654  # sqrt(2/pi)
    return 0.5 * x * (1.0 + jnp.tanh(c * (x + 0.044715 * x * x * x)))


def graph_mixer_kernel(adj_ref, x_ref, g1_ref, be1_ref,
                       wl_ref, bl_ref, wr_ref, br_ref, att_ref, bo_ref,
                       w1_ref, w2_ref, out_ref):
    # adj_ref: (TI, N) f32 additive mask rows for this tile (0 edge / -1e30 non-edge)
    # x_ref:   (N, D)  f32 node features (full, VMEM resident across steps)
    # g1/be1:  (1, D)  f32 LayerNorm weight / bias
    # wl/wr:   (D, D)  bf16 GATv2 lin_l / lin_r (pre-transposed: x @ W)
    # bl/br:   (1, D)  f32 biases; att/bo: (1, D) f32 attention vector / out bias
    # w1:      (D, H)  bf16 MLP Linear 1 (pre-transposed); w2: (H, D) bf16 Linear 2
    # out_ref: (TI, D) f32 output rows for this tile
    ti, d = out_ref.shape
    row0 = pl.multiple_of(pl.program_id(0) * ti, ti)
    bf16 = lambda v: v.astype(jnp.bfloat16)

    def layer_norm(v):  # eps = 1e-5 (PyTorch default), f32 throughout
        mu = jnp.mean(v, axis=-1, keepdims=True)
        var = jnp.mean(jnp.square(v - mu), axis=-1, keepdims=True)
        return (v - mu) * jax.lax.rsqrt(var + 1e-5) * g1_ref[...] + be1_ref[...]

    # ---- norm1 + GATv2 "source" projection over ALL nodes (gl needed for every j) ----
    # TODO(synk): gl is recomputed per i-tile; at production N hoist it to a
    # preceding grid phase / producer call so it is computed once and stays resident.
    x_full = x_ref[...]                                                 # (N, D)
    xn_full = layer_norm(x_full)
    gl = jnp.dot(bf16(xn_full), wl_ref[...],
                 preferred_element_type=jnp.float32) + bl_ref[...]      # (N, D) f32

    # ---- "target" projection only for this tile's rows ----
    x_tile = x_ref[pl.ds(row0, ti), :]                                  # (TI, D)
    xn_tile = layer_norm(x_tile)
    gr = jnp.dot(bf16(xn_tile), wr_ref[...],
                 preferred_element_type=jnp.float32) + br_ref[...]      # (TI, D) f32

    # ---- attention scores for this tile: e[i,j] = att . leaky_relu(gl[j] + gr[i]) ----
    pair = gl[None, :, :] + gr[:, None, :]                              # (TI, N, D)
    pair = jnp.where(pair >= 0.0, pair, 0.2 * pair)                     # LeakyReLU(0.2)
    scores = jnp.sum(pair * att_ref[...][None], axis=-1)                # (TI, N)
    scores = scores + adj_ref[...]                                      # mask non-edges
    scores = scores - jnp.max(scores, axis=-1, keepdims=True)           # stable softmax
    p = jnp.exp(scores)
    alpha = p * pl.reciprocal(jnp.sum(p, axis=-1, keepdims=True), approx=True)

    attn = jnp.dot(bf16(alpha), bf16(gl),
                   preferred_element_type=jnp.float32) + bo_ref[...]    # (TI, D)
    x1 = x_tile + attn                                                  # first residual

    # ---- channel_mix: Linear(D->H) -> GELU -> Linear(H->D), no biases ----
    h = _gelu_tanh(jnp.dot(bf16(x1), w1_ref[...],
                           preferred_element_type=jnp.float32))         # (TI, H)
    y = x1 + jnp.dot(bf16(h), w2_ref[...],
                     preferred_element_type=jnp.float32)                # (TI, D)

    out_ref[...] = y.astype(out_ref.dtype)                              # lane-dense tile


def _dense_adj_bias(edge_index, n):
    """(N, N) additive mask: 0 where edge j->i exists (incl. self loops), -1e30 else."""
    src, dst = edge_index[0], edge_index[1]
    adj = jnp.zeros((n, n), dtype=bool)
    adj = adj.at[dst, src].set(True)                      # message flows src -> dst
    adj = adj.at[jnp.arange(n), jnp.arange(n)].set(True)  # add_self_loops=True
    # NOTE: duplicate edges collapse here (PyG would count them twice); rows with
    # no edges only stay finite because of the self loop.
    # TODO(synk): at production N ship this as int8 and build the -1e30 bias
    # in-kernel to cut the O(N^2) HBM->VMEM bytes 4x (irrelevant at N=16).
    return jnp.where(adj, 0.0, NEG_INF).astype(jnp.float32)


def graph_mixer_forward(x, edge_index, params, *, tile_i=8):
    n, d = x.shape
    assert n % tile_i == 0, "tile_i must divide the node count"
    adj_bias = _dense_adj_bias(edge_index, n)

    row = lambda v: v.reshape(1, -1).astype(jnp.float32)
    bf16w = lambda w: w.astype(jnp.bfloat16)  # bf16 MXU operands, f32 accumulation
    operands = [
        adj_bias,                                   # (N, N) f32, tiled over rows
        x.astype(jnp.float32),                      # (N, D) f32, resident
        row(params["gamma1"]), row(params["beta1"]),
        bf16w(params["wl_t"]), row(params["bl"]),
        bf16w(params["wr_t"]), row(params["br"]),
        row(params["att"]), row(params["bias_out"]),
        bf16w(params["w1_t"]), bf16w(params["w2_t"]),
    ]

    const = lambda shape: pl.BlockSpec(shape, lambda i: (0, 0))  # resident across steps
    in_specs = [pl.BlockSpec((tile_i, n), lambda i: (i, 0))]     # adjacency rows per tile
    in_specs += [const(op.shape) for op in operands[1:]]

    return pl.pallas_call(
        graph_mixer_kernel,
        out_shape=jax.ShapeDtypeStruct((n, d), jnp.float32),
        grid=(n // tile_i,),
        in_specs=in_specs,
        out_specs=pl.BlockSpec((tile_i, d), lambda i: (i, 0)),   # disjoint lane-dense tiles
        compiler_params=pltpu.CompilerParams(
            # row tiles are independent -> v7x can split them across its 2 TCs
            dimension_semantics=("parallel",),
            # explicit scoped-VMEM budget; re-derive tile_i against 64 MiB on v7x
            # if N / D are scaled up.
            vmem_limit_bytes=32 * 1024 * 1024),
    )(*operands)


def graph_mixer_reference(x, edge_index, params):
    """Pure-JAX f32 reference with identical semantics (inference mode)."""
    n, d = x.shape
    hi = jax.lax.Precision.HIGHEST
    src, dst = edge_index[0], edge_index[1]
    adj = jnp.zeros((n, n), dtype=bool).at[dst, src].set(True)
    adj = adj.at[jnp.arange(n), jnp.arange(n)].set(True)

    mu = jnp.mean(x, axis=-1, keepdims=True)
    var = jnp.mean(jnp.square(x - mu), axis=-1, keepdims=True)
    xn = (x - mu) / jnp.sqrt(var + 1e-5) * params["gamma1"] + params["beta1"]

    gl = jnp.dot(xn, params["wl_t"], precision=hi) + params["bl"]
    gr = jnp.dot(xn, params["wr_t"], precision=hi) + params["br"]
    pair = gl[None, :, :] + gr[:, None, :]
    pair = jnp.where(pair >= 0, pair, 0.2 * pair)
    scores = jnp.einsum("ijd,d->ij", pair, params["att"], precision=hi)
    scores = jnp.where(adj, scores, NEG_INF)
    alpha = jax.nn.softmax(scores, axis=-1)
    x1 = x + jnp.dot(alpha, gl, precision=hi) + params["bias_out"]

    h = _gelu_tanh(jnp.dot(x1, params["w1_t"], precision=hi))
    return x1 + jnp.dot(h, params["w2_t"], precision=hi)


if __name__ == "__main__":
    N = 16          # number of graph nodes
    DIM = 128       # feature dim (multiple of 128 -> lane-dense output)
    HID = DIM * 4   # mlp_ratio = 4.0

    key = jax.random.PRNGKey(0)
    ks = jax.random.split(key, 10)

    x = jax.random.normal(ks[0], (N, DIM), dtype=jnp.float32)

    # deterministic bidirectional ring graph: edges i<->i+1 (mod N)
    idx = jnp.arange(N, dtype=jnp.int32)
    nxt = (idx + 1) % N
    edge_index = jnp.stack([jnp.concatenate([idx, nxt]),
                            jnp.concatenate([nxt, idx])])          # (2, 2N)

    params = {
        # LayerNorm (norm1)
        "gamma1":   1.0 + 0.1 * jax.random.normal(ks[1], (DIM,), jnp.float32),
        "beta1":    0.1 * jax.random.normal(ks[2], (DIM,), jnp.float32),
        # GATv2Conv: lin_l / lin_r (stored pre-transposed as (in, out)), att, out bias
        "wl_t":     0.05 * jax.random.normal(ks[3], (DIM, DIM), jnp.float32),
        "bl":       0.05 * jax.random.normal(ks[4], (DIM,), jnp.float32),
        "wr_t":     0.05 * jax.random.normal(ks[5], (DIM, DIM), jnp.float32),
        "br":       0.05 * jax.random.normal(ks[6], (DIM,), jnp.float32),
        "att":      0.05 * jax.random.normal(ks[7], (DIM,), jnp.float32),
        "bias_out": 0.05 * jax.random.normal(ks[8], (DIM,), jnp.float32),
        # MLP (channel_mix): Linear(D,H,no bias) -> GELU -> Linear(H,D,no bias)
        "w1_t":     0.02 * jax.random.normal(ks[9], (DIM, HID), jnp.float32),
        "w2_t":     0.02 * jax.random.normal(jax.random.PRNGKey(1), (HID, DIM), jnp.float32),
    }

    out = graph_mixer_forward(x, edge_index, params, tile_i=8)
    out = jax.block_until_ready(out)

    ref = graph_mixer_reference(x, edge_index, params)
    assert out.shape == (N, DIM)
    max_err = float(jnp.max(jnp.abs(out - ref)))
    # Tolerance accounts for bf16 matmul operands (f32 accumulation) vs f32 reference.
    assert jnp.allclose(out, ref, atol=3e-2, rtol=3e-2), f"max abs err = {max_err}"

    print("KERNEL_OK")
</pallas_src>

<mosaic_0001>
module attributes {stable_mosaic.version = 11 : i64} {
  func.func @graph_mixer_kernel(%arg0: i32, %arg1: memref<8x16xf32, #tpu.memory_space<vmem>>, %arg2: memref<16x128xf32, #tpu.memory_space<vmem>>, %arg3: memref<1x128xf32, #tpu.memory_space<vmem>>, %arg4: memref<1x128xf32, #tpu.memory_space<vmem>>, %arg5: memref<128x128xbf16, #tpu.memory_space<vmem>>, %arg6: memref<1x128xf32, #tpu.memory_space<vmem>>, %arg7: memref<128x128xbf16, #tpu.memory_space<vmem>>, %arg8: memref<1x128xf32, #tpu.memory_space<vmem>>, %arg9: memref<1x128xf32, #tpu.memory_space<vmem>>, %arg10: memref<1x128xf32, #tpu.memory_space<vmem>>, %arg11: memref<128x512xbf16, #tpu.memory_space<vmem>>, %arg12: memref<512x128xbf16, #tpu.memory_space<vmem>>, %arg13: memref<8x128xf32, #tpu.memory_space<vmem>>) attributes {dimension_semantics = [#tpu.dimension_semantics<parallel>], iteration_bounds = array<i64: 2>, scalar_prefetch = 0 : i64, scratch_operands = 0 : i64, tpu.core_type = #tpu.core_type<tc>, window_params = [{transform_indices = @transform_0, window_bounds = array<i64: 8, 16>}, {pipeline_mode = #tpu.pipeline_mode<synchronous>, transform_indices = @transform_1, window_bounds = array<i64: 16, 128>}, {pipeline_mode = #tpu.pipeline_mode<synchronous>, transform_indices = @transform_2, window_bounds = array<i64: 1, 128>}, {pipeline_mode = #tpu.pipeline_mode<synchronous>, transform_indices = @transform_3, window_bounds = array<i64: 1, 128>}, {pipeline_mode = #tpu.pipeline_mode<synchronous>, transform_indices = @transform_4, window_bounds = array<i64: 128, 128>}, {pipeline_mode = #tpu.pipeline_mode<synchronous>, transform_indices = @transform_5, window_bounds = array<i64: 1, 128>}, {pipeline_mode = #tpu.pipeline_mode<synchronous>, transform_indices = @transform_6, window_bounds = array<i64: 128, 128>}, {pipeline_mode = #tpu.pipeline_mode<synchronous>, transform_indices = @transform_7, window_bounds = array<i64: 1, 128>}, {pipeline_mode = #tpu.pipeline_mode<synchronous>, transform_indices = @transform_8, window_bounds = array<i64: 1, 128>}, {pipeline_mode = #tpu.pipeline_mode<synchronous>, transform_indices = @transform_9, window_bounds = array<i64: 1, 128>}, {pipeline_mode = #tpu.pipeline_mode<synchronous>, transform_indices = @transform_10, window_bounds = array<i64: 128, 512>}, {pipeline_mode = #tpu.pipeline_mode<synchronous>, transform_indices = @transform_11, window_bounds = array<i64: 512, 128>}, {transform_indices = @transform_12, window_bounds = array<i64: 8, 128>}]} {
    %c8_i32 = arith.constant 8 : i32
    %0 = arith.muli %arg0, %c8_i32 : i32
    %1 = tpu.assume_multiple %0, 8 : i32
    %c0 = arith.constant 0 : index
    %c0_0 = arith.constant 0 : index
    %2 = vector.load %arg2[%c0, %c0_0] : memref<16x128xf32, #tpu.memory_space<vmem>>, vector<16x128xf32>
    %cst = arith.constant dense<0.000000e+00> : vector<16xf32>
    %3 = vector.multi_reduction <add>, %2, %cst [1] : vector<16x128xf32> to vector<16xf32>
    %4 = vector.shape_cast %3 : vector<16xf32> to vector<16x1xf32>
    %cst_1 = arith.constant 1.280000e+02 : f32
    %5 = vector.broadcast %cst_1 : f32 to vector<16x1xf32>
    %6 = arith.divf %4, %5 : vector<16x1xf32>
    %7 = vector.broadcast %6 : vector<16x1xf32> to vector<16x128xf32>
    %8 = arith.subf %2, %7 : vector<16x128xf32>
    %9 = arith.mulf %8, %8 : vector<16x128xf32>
    %cst_2 = arith.constant dense<0.000000e+00> : vector<16xf32>
    %10 = vector.multi_reduction <add>, %9, %cst_2 [1] : vector<16x128xf32> to vector<16xf32>
    %11 = vector.shape_cast %10 : vector<16xf32> to vector<16x1xf32>
    %cst_3 = arith.constant 1.280000e+02 : f32
    %12 = vector.broadcast %cst_3 : f32 to vector<16x1xf32>
    %13 = arith.divf %11, %12 : vector<16x1xf32>
    %14 = vector.broadcast %6 : vector<16x1xf32> to vector<16x128xf32>
    %15 = arith.subf %2, %14 : vector<16x128xf32>
    %cst_4 = arith.constant 9.99999974E-6 : f32
    %16 = vector.broadcast %cst_4 : f32 to vector<16x1xf32>
    %17 = arith.addf %13, %16 : vector<16x1xf32>
    %18 = math.rsqrt %17 : vector<16x1xf32>
    %19 = vector.broadcast %18 : vector<16x1xf32> to vector<16x128xf32>
    %20 = arith.mulf %15, %19 : vector<16x128xf32>
    %c0_5 = arith.constant 0 : index
    %c0_6 = arith.constant 0 : index
    %21 = vector.load %arg3[%c0_5, %c0_6] : memref<1x128xf32, #tpu.memory_space<vmem>>, vector<1x128xf32>
    %22 = vector.broadcast %21 : vector<1x128xf32> to vector<16x128xf32>
    %23 = arith.mulf %20, %22 : vector<16x128xf32>
    %c0_7 = arith.constant 0 : index
    %c0_8 = arith.constant 0 : index
    %24 = vector.load %arg4[%c0_7, %c0_8] : memref<1x128xf32, #tpu.memory_space<vmem>>, vector<1x128xf32>
    %25 = vector.broadcast %24 : vector<1x128xf32> to vector<16x128xf32>
    %26 = arith.addf %23, %25 : vector<16x128xf32>
    %27 = arith.truncf %26 : vector<16x128xf32> to vector<16x128xbf16>
    %c0_9 = arith.constant 0 : index
    %c0_10 = arith.constant 0 : index
    %28 = vector.load %arg5[%c0_9, %c0_10] : memref<128x128xbf16, #tpu.memory_space<vmem>>, vector<128x128xbf16>
    %cst_11 = arith.constant dense<0.000000e+00> : vector<16x128xf32>
    %29 = tpu.matmul %27, %28, %cst_11 {dimension_numbers = #tpu.dot_dimension_numbers<[1], [0], [0], [1], [0, 0, 1, 1], [], []>} : vector<16x128xbf16>, vector<128x128xbf16>, vector<16x128xf32> -> vector<16x128xf32>
    %c0_12 = arith.constant 0 : index
    %c0_13 = arith.constant 0 : index
    %30 = vector.load %arg6[%c0_12, %c0_13] : memref<1x128xf32, #tpu.memory_space<vmem>>, vector<1x128xf32>
    %31 = vector.broadcast %30 : vector<1x128xf32> to vector<16x128xf32>
    %32 = arith.addf %29, %31 : vector<16x128xf32>
    %33 = arith.index_cast %1 : i32 to index
    %c0_14 = arith.constant 0 : index
    %34 = vector.load %arg2[%33, %c0_14] : memref<16x128xf32, #tpu.memory_space<vmem>>, vector<8x128xf32>
    %cst_15 = arith.constant dense<0.000000e+00> : vector<8xf32>
    %35 = vector.multi_reduction <add>, %34, %cst_15 [1] : vector<8x128xf32> to vector<8xf32>
    %36 = vector.shape_cast %35 : vector<8xf32> to vector<8x1xf32>
    %cst_16 = arith.constant 1.280000e+02 : f32
    %37 = vector.broadcast %cst_16 : f32 to vector<8x1xf32>
    %38 = arith.divf %36, %37 : vector<8x1xf32>
    %39 = vector.broadcast %38 : vector<8x1xf32> to vector<8x128xf32>
    %40 = arith.subf %34, %39 : vector<8x128xf32>
    %41 = arith.mulf %40, %40 : vector<8x128xf32>
    %cst_17 = arith.constant dense<0.000000e+00> : vector<8xf32>
    %42 = vector.multi_reduction <add>, %41, %cst_17 [1] : vector<8x128xf32> to vector<8xf32>
    %43 = vector.shape_cast %42 : vector<8xf32> to vector<8x1xf32>
    %cst_18 = arith.constant 1.280000e+02 : f32
    %44 = vector.broadcast %cst_18 : f32 to vector<8x1xf32>
    %45 = arith.divf %43, %44 : vector<8x1xf32>
    %46 = vector.broadcast %38 : vector<8x1xf32> to vector<8x128xf32>
    %47 = arith.subf %34, %46 : vector<8x128xf32>
    %cst_19 = arith.constant 9.99999974E-6 : f32
    %48 = vector.broadcast %cst_19 : f32 to vector<8x1xf32>
    %49 = arith.addf %45, %48 : vector<8x1xf32>
    %50 = math.rsqrt %49 : vector<8x1xf32>
    %51 = vector.broadcast %50 : vector<8x1xf32> to vector<8x128xf32>
    %52 = arith.mulf %47, %51 : vector<8x128xf32>
    %c0_20 = arith.constant 0 : index
    %c0_21 = arith.constant 0 : index
    %53 = vector.load %arg3[%c0_20, %c0_21] : memref<1x128xf32, #tpu.memory_space<vmem>>, vector<1x128xf32>
    %54 = vector.broadcast %53 : vector<1x128xf32> to vector<8x128xf32>
    %55 = arith.mulf %52, %54 : vector<8x128xf32>
    %c0_22 = arith.constant 0 : index
    %c0_23 = arith.constant 0 : index
    %56 = vector.load %arg4[%c0_22, %c0_23] : memref<1x128xf32, #tpu.memory_space<vmem>>, vector<1x128xf32>
    %57 = vector.broadcast %56 : vector<1x128xf32> to vector<8x128xf32>
    %58 = arith.addf %55, %57 : vector<8x128xf32>
    %59 = arith.truncf %58 : vector<8x128xf32> to vector<8x128xbf16>
    %c0_24 = arith.constant 0 : index
    %c0_25 = arith.constant 0 : index
    %60 = vector.load %arg7[%c0_24, %c0_25] : memref<128x128xbf16, #tpu.memory_space<vmem>>, vector<128x128xbf16>
    %cst_26 = arith.constant dense<0.000000e+00> : vector<8x128xf32>
    %61 = tpu.matmul %59, %60, %cst_26 {dimension_numbers = #tpu.dot_dimension_numbers<[1], [0], [0], [1], [0, 0, 1, 1], [], []>} : vector<8x128xbf16>, vector<128x128xbf16>, vector<8x128xf32> -> vector<8x128xf32>
    %c0_27 = arith.constant 0 : index
    %c0_28 = arith.constant 0 : index
    %62 = vector.load %arg8[%c0_27, %c0_28] : memref<1x128xf32, #tpu.memory_space<vmem>>, vector<1x128xf32>
    %63 = vector.broadcast %62 : vector<1x128xf32> to vector<8x128xf32>
    %64 = arith.addf %61, %63 : vector<8x128xf32>
    %65 = vector.shape_cast %32 : vector<16x128xf32> to vector<1x16x128xf32>
    %66 = vector.shape_cast %64 : vector<8x128xf32> to vector<8x1x128xf32>
    %67 = vector.broadcast %65 : vector<1x16x128xf32> to vector<8x16x128xf32>
    %68 = vector.broadcast %66 : vector<8x1x128xf32> to vector<8x16x128xf32>
    %69 = arith.addf %67, %68 : vector<8x16x128xf32>
    %cst_29 = arith.constant 0.000000e+00 : f32
    %70 = vector.broadcast %cst_29 : f32 to vector<8x16x128xf32>
    %71 = arith.cmpf oge, %69, %70 : vector<8x16x128xf32>
    %cst_30 = arith.constant 2.000000e-01 : f32
    %72 = vector.broadcast %cst_30 : f32 to vector<8x16x128xf32>
    %73 = arith.mulf %72, %69 : vector<8x16x128xf32>
    %74 = arith.select %71, %69, %73 : vector<8x16x128xi1>, vector<8x16x128xf32>
    %c0_31 = arith.constant 0 : index
    %c0_32 = arith.constant 0 : index
    %75 = vector.load %arg9[%c0_31, %c0_32] : memref<1x128xf32, #tpu.memory_space<vmem>>, vector<1x128xf32>
    %76 = vector.shape_cast %75 : vector<1x128xf32> to vector<1x1x128xf32>
    %77 = vector.broadcast %76 : vector<1x1x128xf32> to vector<8x16x128xf32>
    %78 = arith.mulf %74, %77 : vector<8x16x128xf32>
    %cst_33 = arith.constant dense<0.000000e+00> : vector<8x16xf32>
    %79 = vector.multi_reduction <add>, %78, %cst_33 [2] : vector<8x16x128xf32> to vector<8x16xf32>
    %c0_34 = arith.constant 0 : index
    %c0_35 = arith.constant 0 : index
    %80 = vector.load %arg1[%c0_34, %c0_35] : memref<8x16xf32, #tpu.memory_space<vmem>>, vector<8x16xf32>
    %81 = arith.addf %79, %80 : vector<8x16xf32>
    %cst_36 = arith.constant dense<0xFF800000> : vector<8xf32>
    %82 = vector.multi_reduction <maximumf>, %81, %cst_36 [1] : vector<8x16xf32> to vector<8xf32>
    %83 = vector.shape_cast %82 : vector<8xf32> to vector<8x1xf32>
    %84 = vector.broadcast %83 : vector<8x1xf32> to vector<8x16xf32>
    %85 = arith.subf %81, %84 : vector<8x16xf32>
    %86 = math.exp %85 : vector<8x16xf32>
    %cst_37 = arith.constant dense<0.000000e+00> : vector<8xf32>
    %87 = vector.multi_reduction <add>, %86, %cst_37 [1] : vector<8x16xf32> to vector<8xf32>
    %88 = vector.shape_cast %87 : vector<8xf32> to vector<8x1xf32>
    %89 = tpu.reciprocal %88 {approx = true} : vector<8x1xf32> -> vector<8x1xf32>
    %90 = vector.broadcast %89 : vector<8x1xf32> to vector<8x16xf32>
    %91 = arith.mulf %86, %90 : vector<8x16xf32>
    %92 = arith.truncf %91 : vector<8x16xf32> to vector<8x16xbf16>
    %93 = arith.truncf %32 : vector<16x128xf32> to vector<16x128xbf16>
    %cst_38 = arith.constant dense<0.000000e+00> : vector<8x128xf32>
    %94 = tpu.matmul %92, %93, %cst_38 {dimension_numbers = #tpu.dot_dimension_numbers<[1], [0], [0], [1], [0, 0, 1, 1], [], []>} : vector<8x16xbf16>, vector<16x128xbf16>, vector<8x128xf32> -> vector<8x128xf32>
    %c0_39 = arith.constant 0 : index
    %c0_40 = arith.constant 0 : index
    %95 = vector.load %arg10[%c0_39, %c0_40] : memref<1x128xf32, #tpu.memory_space<vmem>>, vector<1x128xf32>
    %96 = vector.broadcast %95 : vector<1x128xf32> to vector<8x128xf32>
    %97 = arith.addf %94, %96 : vector<8x128xf32>
    %98 = arith.addf %34, %97 : vector<8x128xf32>
    %99 = arith.truncf %98 : vector<8x128xf32> to vector<8x128xbf16>
    %c0_41 = arith.constant 0 : index
    %c0_42 = arith.constant 0 : index
    %100 = vector.load %arg11[%c0_41, %c0_42] : memref<128x512xbf16, #tpu.memory_space<vmem>>, vector<128x512xbf16>
    %cst_43 = arith.constant dense<0.000000e+00> : vector<8x512xf32>
    %101 = tpu.matmul %99, %100, %cst_43 {dimension_numbers = #tpu.dot_dimension_numbers<[1], [0], [0], [1], [0, 0, 1, 1], [], []>} : vector<8x128xbf16>, vector<128x512xbf16>, vector<8x512xf32> -> vector<8x512xf32>
    %cst_44 = arith.constant 5.000000e-01 : f32
    %102 = vector.broadcast %cst_44 : f32 to vector<8x512xf32>
    %103 = arith.mulf %102, %101 : vector<8x512xf32>
    %cst_45 = arith.constant 4.471500e-02 : f32
    %104 = vector.broadcast %cst_45 : f32 to vector<8x512xf32>
    %105 = arith.mulf %104, %101 : vector<8x512xf32>
    %106 = arith.mulf %105, %101 : vector<8x512xf32>
    %107 = arith.mulf %106, %101 : vector<8x512xf32>
    %108 = arith.addf %101, %107 : vector<8x512xf32>
    %cst_46 = arith.constant 0.797884583 : f32
    %109 = vector.broadcast %cst_46 : f32 to vector<8x512xf32>
    %110 = arith.mulf %109, %108 : vector<8x512xf32>
    %111 = math.tanh %110 : vector<8x512xf32>
    %cst_47 = arith.constant 1.000000e+00 : f32
    %112 = vector.broadcast %cst_47 : f32 to vector<8x512xf32>
    %113 = arith.addf %112, %111 : vector<8x512xf32>
    %114 = arith.mulf %103, %113 : vector<8x512xf32>
    %115 = arith.truncf %114 : vector<8x512xf32> to vector<8x512xbf16>
    %c0_48 = arith.constant 0 : index
    %c0_49 = arith.constant 0 : index
    %116 = vector.load %arg12[%c0_48, %c0_49] : memref<512x128xbf16, #tpu.memory_space<vmem>>, vector<512x128xbf16>
    %cst_50 = arith.constant dense<0.000000e+00> : vector<8x128xf32>
    %117 = tpu.matmul %115, %116, %cst_50 {dimension_numbers = #tpu.dot_dimension_numbers<[1], [0], [0], [1], [0, 0, 1, 1], [], []>} : vector<8x512xbf16>, vector<512x128xbf16>, vector<8x128xf32> -> vector<8x128xf32>
    %118 = arith.addf %98, %117 : vector<8x128xf32>
    %c0_51 = arith.constant 0 : index
    %c0_52 = arith.constant 0 : index
    %119 = vector.load %arg13[%c0_51, %c0_52] : memref<8x128xf32, #tpu.memory_space<vmem>>, vector<8x128xf32>
    tpu.vector_store %arg13[%c0_51, %c0_52], %118 {strides = array<i32>} : memref<8x128xf32, #tpu.memory_space<vmem>>, vector<8x128xf32>,
    return
  }
  func.func @transform_0(%arg0: i32) -> (i32, i32) {
    %c0_i32 = arith.constant 0 : i32
    %c0_i32_0 = arith.constant 0 : i32
    return %arg0, %c0_i32 : i32, i32
  }
  func.func @transform_1(%arg0: i32) -> (i32, i32) {
    %c0_i32 = arith.constant 0 : i32
    %c0_i32_0 = arith.constant 0 : i32
    %c0_i32_1 = arith.constant 0 : i32
    return %c0_i32, %c0_i32_0 : i32, i32
  }
  func.func @transform_2(%arg0: i32) -> (i32, i32) {
    %c0_i32 = arith.constant 0 : i32
    %c0_i32_0 = arith.constant 0 : i32
    %c0_i32_1 = arith.constant 0 : i32
    return %c0_i32, %c0_i32_0 : i32, i32
  }
  func.func @transform_3(%arg0: i32) -> (i32, i32) {
    %c0_i32 = arith.constant 0 : i32
    %c0_i32_0 = arith.constant 0 : i32
    %c0_i32_1 = arith.constant 0 : i32
    return %c0_i32, %c0_i32_0 : i32, i32
  }
  func.func @transform_4(%arg0: i32) -> (i32, i32) {
    %c0_i32 = arith.constant 0 : i32
    %c0_i32_0 = arith.constant 0 : i32
    %c0_i32_1 = arith.constant 0 : i32
    return %c0_i32, %c0_i32_0 : i32, i32
  }
  func.func @transform_5(%arg0: i32) -> (i32, i32) {
    %c0_i32 = arith.constant 0 : i32
    %c0_i32_0 = arith.constant 0 : i32
    %c0_i32_1 = arith.constant 0 : i32
    return %c0_i32, %c0_i32_0 : i32, i32
  }
  func.func @transform_6(%arg0: i32) -> (i32, i32) {
    %c0_i32 = arith.constant 0 : i32
    %c0_i32_0 = arith.constant 0 : i32
    %c0_i32_1 = arith.constant 0 : i32
    return %c0_i32, %c0_i32_0 : i32, i32
  }
  func.func @transform_7(%arg0: i32) -> (i32, i32) {
    %c0_i32 = arith.constant 0 : i32
    %c0_i32_0 = arith.constant 0 : i32
    %c0_i32_1 = arith.constant 0 : i32
    return %c0_i32, %c0_i32_0 : i32, i32
  }
  func.func @transform_8(%arg0: i32) -> (i32, i32) {
    %c0_i32 = arith.constant 0 : i32
    %c0_i32_0 = arith.constant 0 : i32
    %c0_i32_1 = arith.constant 0 : i32
    return %c0_i32, %c0_i32_0 : i32, i32
  }
  func.func @transform_9(%arg0: i32) -> (i32, i32) {
    %c0_i32 = arith.constant 0 : i32
    %c0_i32_0 = arith.constant 0 : i32
    %c0_i32_1 = arith.constant 0 : i32
    return %c0_i32, %c0_i32_0 : i32, i32
  }
  func.func @transform_10(%arg0: i32) -> (i32, i32) {
    %c0_i32 = arith.constant 0 : i32
    %c0_i32_0 = arith.constant 0 : i32
    %c0_i32_1 = arith.constant 0 : i32
    return %c0_i32, %c0_i32_0 : i32, i32
  }
  func.func @transform_11(%arg0: i32) -> (i32, i32) {
    %c0_i32 = arith.constant 0 : i32
    %c0_i32_0 = arith.constant 0 : i32
    %c0_i32_1 = arith.constant 0 : i32
    return %c0_i32, %c0_i32_0 : i32, i32
  }
  func.func @transform_12(%arg0: i32) -> (i32, i32) {
    %c0_i32 = arith.constant 0 : i32
    %c0_i32_0 = arith.constant 0 : i32
    return %arg0, %c0_i32 : i32, i32
  }
}

</mosaic_0001>

<bundles_post_ra>
// kernel: tpu_custom_call.1
= control target key start
LH: loop header
LB: loop body
LE: loop exit
PB: predicated region body
PF: predicated region fallthrough
CT: control target
= control target key end

     0   :  { %s3735_s0 = inlined_call_operand.hbm [shape: f32[16,16], index: 0, kind: input, shape index: {}]   ;;  %s3736_s1 = inlined_call_operand.hbm [shape: f32[16,128], index: 1, kind: input, shape index: {}]   ;;  %s3737_s2 = inlined_call_operand.vmem [shape: f32[1,128], index: 2, kind: input, shape index: {}]   ;;  %s3738_s3 = inlined_call_operand.vmem [shape: f32[1,128], index: 3, kind: input, shape index: {}]   ;;  %s3739_s4 = inlined_call_operand.hbm [shape: bf16[128,128], index: 4, kind: input, shape index: {}]   ;;  %s3740_s5 = inlined_call_operand.vmem [shape: f32[1,128], index: 5, kind: input, shape index: {}]   ;;  %s3741_s6 = inlined_call_operand.hbm [shape: bf16[128,128], index: 6, kind: input, shape index: {}]   ;;  %s3742_s7 = inlined_call_operand.vmem [shape: f32[1,128], index: 7, kind: input, shape index: {}]   ;;  %s3743_s8 = inlined_call_operand.vmem [shape: f32[1,128], index: 8, kind: input, shape index: {}]   ;;  %s3744_s9 = inlined_call_operand.vmem [shape: f32[1,128], index: 9, kind: input, shape index: {}]   ;;  %s3745_s10 = inlined_call_operand.hbm [shape: bf16[128,512], index: 10, kind: input, shape index: {}]   ;;  %s3746_s11 = inlined_call_operand.hbm [shape: bf16[512,128], index: 11, kind: input, shape index: {}]   ;;  %s3747_s12 = inlined_call_operand.hbm [shape: f32[16,128], index: 12, kind: output, shape index: {}]  }
   0x1   :  { %3749 = sst [smem:[#allocation19_spill]] %s3736_s1 }
   0x2   :  { %3750 = sst [smem:[#allocation20_spill]] %s3739_s4 }
   0x3   :  { %3751 = sst [smem:[#allocation21_spill]] %s3741_s6 }
   0x4   :  { %3752 = sst [smem:[#allocation22_spill]] %s3743_s8 }
   0x5   :  { %3753 = sst [smem:[#allocation23_spill]] %s3744_s9 }
   0x6   :  { %3754 = sst [smem:[#allocation24_spill]] %s3747_s12 }
   0x7   :  { %17 = vsyncpa [#allocation3], 0 }
   0x8   :  { %19 = vsyncpa [#allocation3 + $0x1], 0 }
   0x9   :  { %20 = vsyncpa [#allocation6], 0 }
   0xa   :  { %21 = vsyncpa [#allocation9], 0 }
   0xb   :  { %22 = vsyncpa [#allocation12], 0 }
   0xc   :  { %23 = vsyncpa [#allocation4], 0 }
   0xd   :  { %25 = vsyncpa [#allocation4 + $0x1], 0  ;;  %s3155_s21 = smov 0   ;;  %s3157_s22 = smov 0  }
   0xe   :  { %s3159_s23 = smov 0   ;;  %s3161_s24 = smov 0  }
   0xf LB: > { %s3755_s1 = sld [smem:[#allocation19_spill]]  ;;  %s3179_s28 = sadd.s32 4294967295, %s3075_s24   ;;  %s3075_s24 = sphi %s3161_s24, %s3771_s24   ;;  %s3071_s23 = sphi %s3159_s23, %s3770_s23   ;;  %s3067_s22 = sphi %s3157_s22, %s3769_s22   ;;  %s3063_s21 = sphi %s3155_s21, %s3768_s21  }
  0x10   : > { %p2219_p0 = scmp.ge.s32.totalorder %s3075_s24, 1  ;;  %p52_p1 = scmp.eq.s32.totalorder %s3179_s28, 0 }
  0x11   : > { %p319_p2 = scmp.lt.s32.totalorder %s3075_s24, 3  ;;  %s3077_s30 = smov [#allocation5]  }
  0x12   : > { %s332_s13 = sshll.u32 %s3077_s30, 4  ;;  %s3758_s6 = sld [smem:[#allocation21_spill]]  ;;  %s333_s13 = int_to_ptr.vmem [resolvable:$true] %s332_s13 }
  0x13   : > { %p3184_p3 = pnand %p2219_p0, %p319_p2  ;;  %s3078_s18 = smov 128  }
  0x14   : > { %s3079_s19 = smov 8   ;;  %s3080_s20 = smov [#allocation8]  }
  0x15   : > { %s330_s27 = sshll.u32 %s3755_s1, 4  ;;  %p2666_p4 = pneg %p3184_p3  ;;  %s331_s27 = int_to_ptr.hbm [resolvable:$true] %s330_s27 }
  0x16   : > { %s369_s25 = sshll.u32 %s3080_s20, 4  ;;  %s3759_s4 = sld [smem:[#allocation20_spill]]  ;;  %s370_s25 = int_to_ptr.vmem [resolvable:$true] %s369_s25 }
  0x17   : > { %p3193_p6 = pnand %p2666_p4, %p52_p1  ;;  %s3081_s12 = smov 64  }
  0x18   : > { %s367_s17 = sshll.u32 %s3758_s6, 4  ;;  %s3082_s15 = smov 4   ;;  %s368_s17 = int_to_ptr.hbm [resolvable:$true] %s367_s17 }
  0x19   : > { %2669 = dma.hbm_to_vmem [thread:$0]  (!%p3193_p6), %s331_s27, 256, %s333_s13, [#allocation6], %s3078_s18, %s3078_s18, %s3079_s19  }
  0x1a   : > { %2675 = dma.hbm_to_vmem [thread:$0]  (!%p3193_p6), %s368_s17, 1024, %s370_s25, [#allocation9], %s3081_s12, %s3081_s12, %s3082_s15  }
  0x1b   : > { %s390_s9 = sshll.u32 %s3745_s10, 4  ;;  %s3083_s8 = smov [#allocation7]   ;;  %s391_s9 = int_to_ptr.hbm [resolvable:$true] %s390_s9 }
  0x1c   : > { %s350_s1 = sshll.u32 %s3759_s4, 4  ;;  %s352_s27 = sshll.u32 %s3083_s8, 4  ;;  %s351_s1 = int_to_ptr.hbm [resolvable:$true] %s350_s1  ;;  %s353_s27 = int_to_ptr.vmem [resolvable:$true] %s352_s27 }
  0x1d   : > { %2672 = dma.hbm_to_vmem [thread:$0]  (!%p3193_p6), %s351_s1, 1024, %s353_s27, [#allocation6], %s3081_s12, %s3081_s12, %s3082_s15  }
  0x1e   : > { %s3084_s13 = smov [#allocation10]   ;;  %s3085_s17 = smov 256  }
  0x1f   : > { %s392_s18 = sshll.u32 %s3084_s13, 4  ;;  %s3086_s6 = smov 16   ;;  %s393_s18 = int_to_ptr.vmem [resolvable:$true] %s392_s18 }
  0x20   : > { %2678 = dma.hbm_to_vmem [thread:$0]  (!%p3193_p6), %s391_s9, 4096, %s393_s18, [#allocation9], %s3085_s17, %s3085_s17, %s3086_s6  }
  0x21   : > { %s404_s20 = sshll.u32 %s3746_s11, 4  ;;  %s3087_s1 = smov [#allocation11]   ;;  %s405_s20 = int_to_ptr.hbm [resolvable:$true] %s404_s20 }
  0x22   : > { %s406_s25 = sshll.u32 %s3087_s1, 4  ;;  %s2218_s26 = sadd.s32 4294967294, %s3075_s24   ;;  %s407_s25 = int_to_ptr.vmem [resolvable:$true] %s406_s25 }
  0x23   : > { %2681 = dma.hbm_to_vmem [thread:$0]  (!%p3193_p6), %s405_s20, 4096, %s407_s25, [#allocation12], %s3081_s12, %s3081_s12, %s3082_s15  }
  0x24   : > { %s3221_s30 = sadd.s32 1, %s3075_s24   ;;  %s38_s16 = sadd.s32 1, %s3071_s23 }
  0x25   : > { %s35_s9 = ssub.s32 %s3075_s24, %s3221_s30  ;;  %p45_p7 = scmp.ne.s32.totalorder %s3071_s23, %s3067_s22 }
  0x26   : > { %p36_p8 = scmp.eq.s32.totalorder %s35_s9, 0  ;;  %p46_p9 = scmp.eq.s32.totalorder %s3075_s24, 0 }
  0x27   : > { %p51_p10 = scmp.ne.s32.totalorder %s3067_s22, %s3063_s21  ;;  %p306_p11 = scmp.eq.s32.totalorder %s3179_s28, 1 }
  0x28   : > { %s3233_s27 = scalar_select %p36_p8, %s3071_s23, %s38_s16  }
  0x29   : > { %p3237_p12 = por %p52_p1, %p51_p10  ;;  %p3241_p13 = por %p306_p11, %p45_p7 }
  0x2a   : > { %p312_p0 = scmp.eq.s32.totalorder %s2218_s26, 1  ;;  %p47_p2 = por %p46_p9, %p45_p7 }
  0x2b   : > { %s420_s15 = sand.u32 1, %s3071_s23   ;;  %p2695_p6 = scmp.lt.s32.totalorder %s3075_s24, 2 }
  0x2c   : > { %p3246_p4 = por %p312_p0, %p51_p10  ;;  %s2226_s18 = sshll.u32 %s420_s15, 3 }
  0x2d   : > { %s2227_s17 = sshll.u32 %s3075_s24, 3  ;;  %s424_s1 = scalar_lea.vmem [#allocation2], %s2226_s18 }
  0x2e   : > { %s428_s19 = scalar_lea.hbm %s3735_s0, %s2227_s17  ;;  %s432_s25 = sshll.u32 %s424_s1, 4  ;;  %s433_s25 = int_to_ptr.vmem [resolvable:$true] %s432_s25 }
  0x2f   : > { %s430_s20 = sshll.u32 %s428_s19, 4  ;;  %p3255_p8 = pnand %p2695_p6, %p47_p2  ;;  %s431_s20 = int_to_ptr.hbm [resolvable:$true] %s430_s20 }
  0x30   : > { %s421_s16 = scalar_lea.sflag [#allocation3], %s420_s15  ;;  %s2967_s9 = sshra.s32 %s431_s20, 4  ;;  %s2968_s9 = int_to_ptr.hbm [resolvable:$true] %s2967_s9 }
  0x31   : > { %s2969_s4 = scalar_lea.hbm %s2968_s9, 8  ;;  %p2971_p9 = pneg %p3255_p8 }
  0x32   : > { %p2970_p7 = scmp.ne.s32.totalorder %s2968_s9, %s2969_s4  ;;  %s2974_s18 = scalar_lea.hbm %s3735_s0, 16 }
  0x33   : > { %p2975_p0 = scmp.lt.s32.totalorder %s2968_s9, %s3735_s0  ;;  %p2976_p2 = scmp.lt.s32.totalorder %s2974_s18, %s2969_s4 }
  0x34   : > { %p2972_p10 = pnand %p2971_p9, %p2970_p7 }
  0x35   : > { %p2977_p6 = por %p2976_p2, %p2975_p0 }
  0x36   : > { %p2973_p11 = pneg %p2972_p10 }
  0x38   : > { %p2978_p5 = pnand %p2977_p6, %p2973_p11 }
  0x3a   : > { %2981 = shalt.err (!%p2978_p5)
}
  0x3b   : > { %2685 = dma.hbm_to_vmem [thread:$0]  (!%p3255_p8), %s431_s20, 128, %s433_s25, %s421_s16  }
  0x3c   : > { %441 = sbr.rel (%p3184_p3) target bundleno = 1826 (0x722), region = 68  ;;  %s3272_s15 = sand.u32 (!%p3184_p3), 1, %s3067_s22  }
  0x3d   : > { %s2229_s1 = sshll.u32 (!%p3184_p3), %s3272_s15, 3  ;;  %s444_s17 = scalar_lea.sflag (!%p3184_p3), [#allocation3], %s3272_s15 }
  0x3e   : > { %s3278_s4 = scalar_lea.vmem (!%p3184_p3), [#allocation2], %s2229_s1 }
  0x41   : > { %3042 = dma.done.wait (%p3237_p12), %s444_s17, 128  }
  0x42   : > { %3044 = vsyncadd (%p3237_p12), %s444_s17, 4294967168 }
  0x43   : > { %3046 = dma.done.wait (%p52_p1), [#allocation6], 1280  }
  0x44   : > { %3048 = vsyncadd (%p52_p1), [#allocation6], 4294966016 }
  0x45   : > { %3050 = dma.done.wait (%p52_p1), [#allocation9], 5120  }
  0x46   : > { %3052 = vsyncadd (%p52_p1), [#allocation9], 4294962176 }
  0x47   : > { %3054 = dma.done.wait (%p52_p1), [#allocation12], 4096  }
  0x48   : > { %3056 = vsyncadd (%p52_p1), [#allocation12], 4294963200  ;;  %s2236_s29 = sshll.u32 %s3179_s28, 3  ;;  %v516_v0 = vld [vmem:[#allocation5] sm:$0xff]  ;;  %v517_v2 = vld [vmem:[#allocation5 + $0x8] sm:$0xff]  ;;  %v3088_v3 = vmov 128.0   ;;  %v909_v47 = vlaneseq }
  0x49   : > { %s3299_s14 = scalar_lea.vmem [#allocation5], %s2236_s29  ;;  %518 = vadd.xlane.f32.xlu0 %v516_v0  ;;  %2766 = vrcp.f32 %v3088_v3  ;;  %v2569_v22 = vld [vmem:[#allocation7 + $0x38] sm:$0xff]  ;;  %v2568_v23 = vld [vmem:[#allocation7 + $0x30] sm:$0xff]  ;;  %v2567_v24 = vld [vmem:[#allocation7 + $0x28] sm:$0xff]  ;;  %s3765_s26 = sld [smem:[#allocation23_spill]] }
  0x4a   : > { %v661_v1 = vld [vmem:[%s3299_s14] sm:$0xff]  ;;  %646 = vmatpush.bf16.msra.mxu0 %v2569_v22  ;;  %v2577_v25 = vld [vmem:[#allocation8 + $0x38] sm:$0xff]  ;;  %v2576_v27 = vld [vmem:[#allocation8 + $0x30] sm:$0xff]  ;;  %v3315_v51 = vshrl.u32 %v909_v47, 7  ;;  %s3766_s9 = sld [smem:[#allocation24_spill]]  ;;  %s513_s8 = scalar_lea.vmem [#allocation13], %s2229_s1 }
  0x4b   : > { %662 = vadd.xlane.f32.xlu1 %v661_v1  ;;  %753 = vmatpush.bf16.msra.mxu1 %v2577_v25  ;;  %v2566_v26 = vld [vmem:[#allocation7 + $0x20] sm:$0xff]  ;;  %v2565_v28 = vld [vmem:[#allocation7 + $0x18] sm:$0xff]  ;;  %v2575_v29 = vld [vmem:[#allocation8 + $0x28] sm:$0xff]  ;;  %s2095_s19 = sshll.u32 %s513_s8, 4  ;;  %s2083_s28 = scalar_lea.sflag [#allocation4], %s3272_s15  ;;  %s2096_s19 = int_to_ptr.vmem [resolvable:$true] %s2095_s19 }
  0x4c   : > { %v2564_v30 = vld [vmem:[#allocation7 + $0x10] sm:$0xff]  ;;  %v2574_v31 = vld [vmem:[#allocation8 + $0x20] sm:$0xff]  ;;  %v2563_v32 = vld [vmem:[#allocation7 + $0x8] sm:$0xff]  ;;  %2749 = vset.pattern.permute.xlu2 %v3315_v51  ;;  %2747 = vset.pattern.permute.xlu0 %v3315_v51  ;;  %v3320_v55 = vadd.s32 8, %v3315_v51 }
  0x4d   : > { %v2573_v33 = vld [vmem:[#allocation8 + $0x18] sm:$0xff]  ;;  %v2562_v36 = vld [vmem:[#allocation7] sm:$0xff]  ;;  %v2572_v37 = vld [vmem:[#allocation8 + $0x10] sm:$0xff] }
  0x4e   : > { %647 = vmatpush.bf16.msra.mxu0 %v2568_v23  ;;  %v2571_v39 = vld [vmem:[#allocation8 + $0x8] sm:$0xff]  ;;  %v2570_v41 = vld [vmem:[#allocation8] sm:$0xff]  ;;  %2748 = vset.pattern.permute.xlu1 %v3320_v55 }
  0x4f   : > { %v2767_v4 = vpop.eup %2766  ;;  %754 = vmatpush.bf16.msra.mxu1 %v2576_v27  ;;  %v3323_v58 = vld [vmem:[%s3278_s4] sm:$0xff]  ;;  %s3764_s4 = sld [smem:[#allocation22_spill]] }
  0x50   : > { %v523_v5 = vmul.f32 128.0, %v2767_v4  ;;  %vm527_vm0 = vweird.f32 %v2767_v4  ;;  %v921_v60 = vperm.slane %v3323_v58, 1  ;;  %v908_v61 = vperm.slane %v3323_v58, 0  ;;  %v2760_v3 = vld [vmem:[%s3737_s2] ss:$0 sm:$0xff]  ;;  %s2093_s6 = scalar_lea.hbm %s3766_s9, %s2236_s29  ;;  %s3017_s1 = scalar_lea.hbm %s3766_s9, 16 }
  0x51   : > { %520 = vadd.xlane.f32.xlu0 %v517_v2  ;;  %v960_v23 = vperm.slane %v3323_v58, 4  ;;  %v986_v27 = vperm.slane %v3323_v58, 6  ;;  %s2097_s18 = sshll.u32 %s2093_s6, 4  ;;  %s2098_s18 = int_to_ptr.hbm [resolvable:$true] %s2097_s18 }
  0x52   : > { %v524_v6 = vsub.f32 1.0, %v523_v5  ;;  %648 = vmatpush.bf16.msra.mxu0 %v2567_v24  ;;  %s3011_s17 = sshra.s32 %s2098_s18, 4  ;;  %s3012_s17 = int_to_ptr.hbm [resolvable:$true] %s3011_s17 }
  0x53   : > { %755 = vmatpush.bf16.msra.mxu1 %v2575_v29  ;;  %s3013_s29 = scalar_lea.hbm %s3012_s17, 8  ;;  %p3018_p12 = scmp.lt.s32.totalorder %s3012_s17, %s3766_s9 }
  0x54   : > { %v525_v7 = vmul.f32 %v2767_v4, %v524_v6  ;;  %p3014_p1 = scmp.ne.s32.totalorder %s3012_s17, %s3013_s29  ;;  %p3019_p8 = scmp.lt.s32.totalorder %s3017_s1, %s3013_s29 }
  0x56   : > { %v526_v8 = vadd.f32 %v2767_v4, %v525_v7  ;;  %649 = vmatpush.bf16.msra.mxu0 %v2566_v26  ;;  %p3015_p3 = pnand %p3014_p1, %p3241_p13  ;;  %p3020_p7 = por %p3019_p8, %p3018_p12 }
  0x57   : > { %756 = vmatpush.bf16.msra.mxu1 %v2574_v31  ;;  %v2763_v31 = vld [vmem:[%s3742_s7] ss:$0 sm:$0xff] }
  0x58   : > { %v528_v9 = vsel %vm527_vm0, %v2767_v4, %v526_v8  ;;  %p3016_p5 = pneg %p3015_p3 }
  0x5a   : > { %650 = vmatpush.bf16.msra.mxu0 %v2565_v28  ;;  %v973_v28 = vperm.slane %v3323_v58, 5  ;;  %p3021_p9 = pnand %p3020_p7, %p3016_p5 }
  0x5b   : > { %757 = vmatpush.bf16.msra.mxu1 %v2573_v33 }
  0x5e   : > { %651 = vmatpush.bf16.msra.mxu0 %v2564_v30  ;;  %v2762_v30 = vld [vmem:[%s3740_s5] ss:$0 sm:$0xff] }
  0x5f   : > { %758 = vmatpush.bf16.msra.mxu1 %v2572_v37 }
  0x62   : > { %652 = vmatpush.bf16.msra.mxu0 %v2563_v32 }
  0x63   : > { %759 = vmatpush.bf16.msra.mxu1 %v2571_v39 }
  0x65   : > { %913 = vperm.xlu0 %2747, %v908_v61  }
  0x66   : > { %653 = vmatpush.bf16.msra.mxu0 %v2562_v36 }
  0x67   : > { %760 = vmatpush.bf16.msra.mxu1 %v2570_v41 }
  0xbc   : > { %v519_v10 = vpop.xlane.xlu0 %518 }
  0xbd   : > { %v529_v11 = vmul.f32 %v528_v9, %v519_v10  ;;  %v2761_v10 = vld [vmem:[%s3738_s3] ss:$0 sm:$0xff] }
  0xbe   : > { %v663_v15 = vpop.xlane.xlu1 %662 }
  0xbf   : > { %v3302_v12 = vsub.f32 %v516_v0, %v529_v11  ;;  %v664_v18 = vmul.f32 %v663_v15, %v528_v9  ;;  %v934_v11 = vperm.slane %v3323_v58, 2 }
  0xc1   : > { %v533_v13 = vmul.f32 %v3302_v12, %v3302_v12  ;;  %v3310_v20 = vsub.f32 %v661_v1, %v664_v18  ;;  %939 = vperm.xlu0 %2747, %v934_v11  }
  0xc3   : > { %535 = vadd.xlane.f32.xlu1 %v533_v13  ;;  %v666_v21 = vmul.f32 %v3310_v20, %v3310_v20 }
  0xc4   : > { %v521_v14 = vpop.xlane.xlu0 %520 }
  0xc5   : > { %v530_v16 = vmul.f32 %v528_v9, %v521_v14  ;;  %v947_v14 = vperm.slane %v3323_v58, 3 }
  0xc7   : > { %v3306_v17 = vsub.f32 %v517_v2, %v530_v16 }
  0xc9   : > { %v534_v19 = vmul.f32 %v3306_v17, %v3306_v17  ;;  %965 = vperm.xlu0 %2747, %v960_v23  }
  0xcb   : > { %537 = vadd.xlane.f32.xlu2 %v534_v19 }
  0xd1   : > { %991 = vperm.xlu0 %2747, %v986_v27  }
  0xd3   : > { %667 = vadd.xlane.f32.xlu2 %v666_v21 }
  0xd9   : > { %2754 = vset.pattern.permute.xlu0 %v3320_v55 }
  0xdc   : > { %919 = vperm.xlu1 %2748, %v908_v61  }
  0xe1   : > { %945 = vperm.xlu0 %2754, %v934_v11  }
  0xe4   : > { %958 = vperm.xlu1 %2748, %v947_v14  }
  0xe9   : > { %997 = vperm.xlu0 %2754, %v986_v27  }
  0xeb   : > { %926 = vperm.xlu2 %2749, %v921_v60  }
  0xec   : > { %2753 = vset.pattern.permute.xlu1 %v3315_v51 }
  0xf3   : > { %2750 = vset.pattern.permute.xlu2 %v3320_v55 }
  0xf4   : > { %978 = vperm.xlu1 %2753, %v973_v28  }
  0xfb   : > { %932 = vperm.xlu2 %2750, %v921_v60  }
  0xfc   : > { %2756 = vset.pattern.permute.xlu1 %v3320_v55 }
 0x103   : > { %2751 = vset.pattern.permute.xlu2 %v3315_v51 }
 0x10b   : > { %952 = vperm.xlu2 %2751, %v947_v14  }
 0x113   : > { %2752 = vset.pattern.permute.xlu2 %v3320_v55 }
 0x11b   : > { %971 = vperm.xlu2 %2752, %v960_v23  }
 0x123   : > { %984 = vperm.xlu2 %2752, %v973_v28  }
 0x12b   : > { %2755 = vset.pattern.permute.xlu2 %v3315_v51 }
 0x136   : > { %v536_v34 = vpop.xlane.xlu1 %535 }
 0x137   : > { %v539_v35 = vmul.f32 %v536_v34, %v528_v9 }
 0x139   : > { %v541_v38 = vadd.f32 1e-05, %v539_v35 }
 0x13b   : > { %2768 = vrsqrt.f32 %v541_v38  ;;  %vm549_vm2 = vweird.f32 %v541_v38 }
 0x13e   : > { %v538_v40 = vpop.xlane.xlu2 %537 }
 0x13f   : > { %v540_v42 = vmul.f32 %v538_v40, %v528_v9 }
 0x141   : > { %v2769_v43 = vpop.eup %2768  ;;  %v542_v44 = vadd.f32 1e-05, %v540_v42 }
 0x142   : > { %v544_v45 = vmul.f32 %v2769_v43, %v541_v38  ;;  %vm550_vm1 = vweird.f32 %v2769_v43 }
 0x143   : > { %2770 = vrsqrt.f32 %v542_v44  ;;  %vm551_vm3 = vmor %vm549_vm2, %vm550_vm1  ;;  %vm559_vm5 = vweird.f32 %v542_v44 }
 0x144   : > { %v545_v46 = vmul.f32 %v2769_v43, %v544_v45 }
 0x146   : > { %v546_v48 = vmul.f32 0.5, %v545_v46  ;;  %v668_v49 = vpop.xlane.xlu2 %667 }
 0x147   : > { %v669_v50 = vmul.f32 %v668_v49, %v528_v9 }
 0x148   : > { %v547_v52 = vsub.f32 1.5, %v546_v48  ;;  %v3372_v48 = vld [vmem:[%s3764_s4] ss:$0 sm:$0xff] }
 0x149   : > { %v2771_v53 = vpop.eup %2770  ;;  %v670_v54 = vadd.f32 1e-05, %v669_v50 }
 0x14a   : > { %v548_v56 = vmul.f32 %v2769_v43, %v547_v52  ;;  %v554_v57 = vmul.f32 %v2771_v53, %v542_v44  ;;  %vm560_vm4 = vweird.f32 %v2771_v53 }
 0x14b   : > { %2772 = vrsqrt.f32 %v670_v54  ;;  %vm561_vm6 = vmor %vm559_vm5, %vm560_vm4  ;;  %vm677_vm8 = vweird.f32 %v670_v54 }
 0x14c   : > { %v555_v59 = vmul.f32 %v2771_v53, %v554_v57  ;;  %v552_v63 = vsel %vm551_vm3, %v2769_v43, %v548_v56 }
 0x14d   : > { %v563_v2 = vmul.f32 %v552_v63, %v3302_v12 }
 0x14e   : > { %v556_v62 = vmul.f32 0.5, %v555_v59 }
 0x14f   : > { %v569_v9 = vmul.f32 %v2760_v3, %v563_v2 }
 0x150   : > { %v557_v0 = vsub.f32 1.5, %v556_v62 }
 0x151   : > { %v2773_v1 = vpop.eup %2772  ;;  %v575_v16 = vadd.f32 %v2761_v10, %v569_v9 }
 0x152   : > { %v558_v4 = vmul.f32 %v2771_v53, %v557_v0  ;;  %v672_v5 = vmul.f32 %v2773_v1, %v670_v54  ;;  %vm678_vm7 = vweird.f32 %v2773_v1 }
 0x153   : > { %vm679_vm9 = vmor %vm677_vm8, %vm678_vm7 }
 0x154   : > { %v673_v6 = vmul.f32 %v2773_v1, %v672_v5  ;;  %v562_v7 = vsel %vm561_vm6, %v2771_v53, %v558_v4 }
 0x155   : > { %v564_v8 = vmul.f32 %v562_v7, %v3306_v17 }
 0x156   : > { %v674_v12 = vmul.f32 0.5, %v673_v6 }
 0x157   : > { %v570_v13 = vmul.f32 %v2760_v3, %v564_v8 }
 0x158   : > { %v675_v15 = vsub.f32 1.5, %v674_v12 }
 0x159   : > { %v576_v18 = vadd.f32 %v2761_v10, %v570_v13 }
 0x15a   : > { %v676_v19 = vmul.f32 %v2773_v1, %v675_v15 }
 0x15b   : > { %v577_v17 = vpack.c.bf16 %v576_v18, %v575_v16 }
 0x15c   : > { %v680_v21 = vsel %vm679_vm9, %v2773_v1, %v676_v19 }
 0x15d   : > { %654 = vmatmul.bf16.vlgmr.msra.gmra.mxu0 %v577_v17  ;;  %v681_v22 = vmul.f32 %v680_v21, %v3310_v20  ;;  %v999_v20 = vperm.slane %v3323_v58, 7 }
 0x15f   : > { %v682_v24 = vmul.f32 %v2760_v3, %v681_v22  ;;  %1010 = vperm.xlu1 %2756, %v999_v20   ;;  %1004 = vperm.xlu2 %2755, %v999_v20  }
 0x161   : > { %v683_v25 = vadd.f32 %v2761_v10, %v682_v24 }
 0x163   : > { %v684_v26 = vpack.c.bf16 %v683_v25, %v683_v25 }
 0x165   : > { %761 = vmatmul.bf16.vlgmr.msra.gmra.mxu1 %v684_v26 }
 0x1da   : > { %v655_v29 = vpop.f32.mrf.mxu0 }
 0x1db   : > { %v656_v34 = vadd.f32 %v2762_v30, %v655_v29 }
 0x1e2   : > { %v657_v32 = vpop.f32.mrf.mxu0  ;;  %v762_v33 = vpop.f32.mrf.mxu1 }
 0x1e3   : > { %v3356_v35 = vadd.f32 %v2762_v30, %v657_v32  ;;  %v3358_v36 = vadd.f32 %v2763_v31, %v762_v33 }
 0x1e5   : > { %v1361_v37 = vpack.c.bf16 %v3356_v35, %v656_v34  ;;  %v774_v38 = vperm.slane %v3358_v36, 0  ;;  %v768_v39 = vrot.slane %v3358_v36, 2  ;;  %v767_v40 = vrot.slane %v3358_v36, 1 }
 0x1e6   : > { %v770_v41 = vrot.slane %v3358_v36, 4  ;;  %v769_v42 = vrot.slane %v3358_v36, 3  ;;  %v771_v43 = vrot.slane %v3358_v36, 5  ;;  %v772_v58 = vrot.slane %v3358_v36, 6 }
 0x1e7   : > { %1480 = vmatpush.bf16.msra.mxu2 %v1361_v37  ;;  %v790_v44 = vadd.f32 %v774_v38, %v656_v34  ;;  %v776_v45 = vperm.slane %v768_v39, 0  ;;  %v775_v46 = vperm.slane %v767_v40, 0  ;;  %v773_v2 = vrot.slane %v3358_v36, 7 }
 0x1e8   : > { %v3374_v49 = vperm.slane %v770_v41, 0  ;;  %v3376_v50 = vperm.slane %v769_v42, 0  ;;  %v3378_v51 = vperm.slane %v771_v43, 0  ;;  %v780_v7 = vperm.slane %v772_v58, 0 }
 0x1e9   : > { %vm806_vm10 = vcmp.ge.f32.partialorder %v790_v44, 0.0  ;;  %v822_v52 = vmul.f32 0.2, %v790_v44  ;;  %v794_v53 = vadd.f32 %v776_v45, %v656_v34  ;;  %v792_v54 = vadd.f32 %v775_v46, %v656_v34 }
 0x1ea   : > { %v764_v55 = vpop.f32.mrf.mxu1  ;;  %v798_v56 = vadd.f32 %v3374_v49, %v656_v34  ;;  %v796_v57 = vadd.f32 %v3376_v50, %v656_v34  ;;  %v800_v63 = vadd.f32 %v3378_v51, %v656_v34  ;;  %v793_v10 = vadd.f32 %v775_v46, %v3356_v35 }
 0x1eb   : > { %v838_v59 = vsel %vm806_vm10, %v790_v44, %v822_v52  ;;  %vm810_vm11 = vcmp.ge.f32.partialorder %v794_v53, 0.0  ;;  %v826_v60 = vmul.f32 0.2, %v794_v53  ;;  %vm808_vm12 = vcmp.ge.f32.partialorder %v792_v54, 0.0 }
 0x1ec   : > { %v858_v61 = vmul.f32 %v3372_v48, %v838_v59  ;;  %v824_v62 = vmul.f32 0.2, %v792_v54  ;;  %v830_v1 = vmul.f32 0.2, %v798_v56  ;;  %vm814_vm13 = vcmp.ge.f32.partialorder %v798_v56, 0.0  ;;  %v914_v59 = vpop.permute.xlu0 %913 }
 0x1ed   : > { %v842_v0 = vsel %vm810_vm11, %v794_v53, %v826_v60  ;;  %v828_v6 = vmul.f32 0.2, %v796_v57  ;;  %vm812_vm14 = vcmp.ge.f32.partialorder %v796_v57, 0.0  ;;  %v832_v8 = vmul.f32 0.2, %v800_v63  ;;  %v927_v60 = vpop.permute.xlu2 %926 }
 0x1ee   : > { %874 = vadd.xlane.f32.xlu0 %v858_v61  ;;  %v862_v3 = vmul.f32 %v3372_v48, %v842_v0  ;;  %v840_v4 = vsel %vm808_vm12, %v792_v54, %v824_v62  ;;  %v846_v9 = vsel %vm814_vm13, %v798_v56, %v830_v1  ;;  %vm816_vm15 = vcmp.ge.f32.partialorder %v800_v63, 0.0  ;;  %v920_v1 = vpop.permute.xlu1 %919 }
 0x1ef   : > { %v860_v5 = vmul.f32 %v3372_v48, %v840_v4  ;;  %v781_v11 = vperm.slane %v773_v2, 0  ;;  %v844_v12 = vsel %vm812_vm14, %v796_v57, %v828_v6  ;;  %v802_v13 = vadd.f32 %v780_v7, %v656_v34 }
 0x1f0   : > { %882 = vadd.xlane.f32.xlu1 %v862_v3  ;;  %v866_v14 = vmul.f32 %v3372_v48, %v846_v9  ;;  %v848_v15 = vsel %vm816_vm15, %v800_v63, %v832_v8  ;;  %v825_v18 = vmul.f32 0.2, %v793_v10  ;;  %v864_v19 = vmul.f32 %v3372_v48, %v844_v12 }
 0x1f1   : > { %878 = vadd.xlane.f32.xlu2 %v860_v5  ;;  %v804_v16 = vadd.f32 %v781_v11, %v656_v34  ;;  %vm809_vm0 = vcmp.ge.f32.partialorder %v793_v10, 0.0  ;;  %v868_v17 = vmul.f32 %v3372_v48, %v848_v15  ;;  %v834_v21 = vmul.f32 0.2, %v802_v13 }
 0x1f2   : > { %vm818_vm1 = vcmp.ge.f32.partialorder %v802_v13, 0.0  ;;  %v841_v23 = vsel %vm809_vm0, %v793_v10, %v825_v18  ;;  %v803_v24 = vadd.f32 %v780_v7, %v3356_v35  ;;  %v791_v26 = vadd.f32 %v774_v38, %v3356_v35 }
 0x1f3   : > { %v836_v22 = vmul.f32 0.2, %v804_v16  ;;  %vm820_vm2 = vcmp.ge.f32.partialorder %v804_v16, 0.0  ;;  %v850_v25 = vsel %vm818_vm1, %v802_v13, %v834_v21  ;;  %v861_v27 = vmul.f32 %v3372_v48, %v841_v23 }
 0x1f4   : > { %v795_v20 = vadd.f32 %v776_v45, %v3356_v35  ;;  %v835_v29 = vmul.f32 0.2, %v803_v24  ;;  %v870_v30 = vmul.f32 %v3372_v48, %v850_v25  ;;  %vm819_vm3 = vcmp.ge.f32.partialorder %v803_v24, 0.0  ;;  %v940_v61 = vpop.permute.xlu0 %939 }
 0x1f5   : > { %v852_v28 = vsel %vm820_vm2, %v804_v16, %v836_v22  ;;  %v823_v32 = vmul.f32 0.2, %v791_v26  ;;  %vm807_vm4 = vcmp.ge.f32.partialorder %v791_v26, 0.0  ;;  %v799_v37 = vadd.f32 %v3374_v49, %v3356_v35  ;;  %v933_v62 = vpop.permute.xlu2 %932 }
 0x1f6   : > { %890 = vadd.xlane.f32.xlu0 %v866_v14  ;;  %v872_v31 = vmul.f32 %v3372_v48, %v852_v28  ;;  %v827_v33 = vmul.f32 0.2, %v795_v20  ;;  %v851_v34 = vsel %vm819_vm3, %v803_v24, %v835_v29  ;;  %vm811_vm5 = vcmp.ge.f32.partialorder %v795_v20, 0.0  ;;  %v959_v4 = vpop.permute.xlu1 %958 }
 0x1f7   : > { %v839_v36 = vsel %vm807_vm4, %v791_v26, %v823_v32  ;;  %v871_v38 = vmul.f32 %v3372_v48, %v851_v34  ;;  %v797_v40 = vadd.f32 %v3376_v50, %v3356_v35  ;;  %v831_v43 = vmul.f32 0.2, %v799_v37 }
 0x1f8   : > { %886 = vadd.xlane.f32.xlu1 %v864_v19  ;;  %v843_v39 = vsel %vm811_vm5, %v795_v20, %v827_v33  ;;  %v859_v41 = vmul.f32 %v3372_v48, %v839_v36  ;;  %vm815_vm6 = vcmp.ge.f32.partialorder %v799_v37, 0.0  ;;  %v801_v46 = vadd.f32 %v3378_v51, %v3356_v35 }
 0x1f9   : > { %894 = vadd.xlane.f32.xlu2 %v868_v17  ;;  %v863_v42 = vmul.f32 %v3372_v48, %v843_v39  ;;  %v829_v44 = vmul.f32 0.2, %v797_v40  ;;  %vm813_vm7 = vcmp.ge.f32.partialorder %v797_v40, 0.0  ;;  %v847_v45 = vsel %vm815_vm6, %v799_v37, %v831_v43 }
 0x1fa   : > { %v867_v52 = vmul.f32 %v3372_v48, %v847_v45  ;;  %v833_v53 = vmul.f32 0.2, %v801_v46  ;;  %vm817_vm8 = vcmp.ge.f32.partialorder %v801_v46, 0.0  ;;  %v805_v55 = vadd.f32 %v781_v11, %v3356_v35 }
 0x1fb   : > { %v845_v49 = vsel %vm813_vm7, %v797_v40, %v829_v44  ;;  %v3089_v2 = vmov 0   ;;  %vm1113_vm10 = vcmask 130112   ;;  %vm1136_vm11 = vcmask 1041409  }
 0x1fc   : > { %v865_v50 = vmul.f32 %v3372_v48, %v845_v49  ;;  %v849_v54 = vsel %vm817_vm8, %v801_v46, %v833_v53  ;;  %v837_v57 = vmul.f32 0.2, %v805_v55  ;;  %vm821_vm9 = vcmp.ge.f32.partialorder %v805_v55, 0.0  ;;  %v966_v63 = vpop.permute.xlu0 %965  ;;  %2757 = vset.pattern.permute.xlu0 %v3089_v2  ;;  %2758 = vset.pattern.permute.xlu2 %v3089_v2 }
 0x1fd   : > { %v869_v56 = vmul.f32 %v3372_v48, %v849_v54  ;;  %v953_v0 = vpop.permute.xlu2 %952  ;;  %2759 = vset.pattern.permute.xlu1 %v3089_v2  ;;  %vm1138_vm12 = vcmask 1042434   ;;  %vm1140_vm13 = vcmask 1043459   ;;  %vm1142_vm14 = vcmask 1044484  }
 0x1fe   : > { %880 = vadd.xlane.f32.xlu0 %v861_v27  ;;  %v853_v58 = vsel %vm821_vm9, %v805_v55, %v837_v57  ;;  %v979_v6 = vpop.permute.xlu1 %978  ;;  %v3463_v55 = vand.u32 127, %v909_v47  ;;  %vm1144_vm15 = vcmask 1045509   ;;  %vm1146_vm0 = vcmask 1046534  }
 0x1ff   : > { %v873_v51 = vmul.f32 %v3372_v48, %v853_v58  ;;  %vm1148_vm1 = vcmask 1047559   ;;  %vm1151_vm2 = vcmask 130048  }
 0x200   : > { %898 = vadd.xlane.f32.xlu1 %v870_v30 }
 0x201   : > { %902 = vadd.xlane.f32.xlu2 %v872_v31 }
 0x204   : > { %v992_v35 = vpop.permute.xlu0 %991 }
 0x205   : > { %v972_v3 = vpop.permute.xlu2 %971 }
 0x206   : > { %900 = vadd.xlane.f32.xlu0 %v871_v38  ;;  %v1011_v48 = vpop.permute.xlu1 %1010 }
 0x208   : > { %876 = vadd.xlane.f32.xlu1 %v859_v41 }
 0x209   : > { %884 = vadd.xlane.f32.xlu2 %v863_v42 }
 0x20c   : > { %v946_v5 = vpop.permute.xlu0 %945 }
 0x20d   : > { %v985_v7 = vpop.permute.xlu2 %984 }
 0x210   : > { %892 = vadd.xlane.f32.xlu1 %v867_v52 }
 0x211   : > { %888 = vadd.xlane.f32.xlu2 %v865_v50 }
 0x214   : > { %v998_v8 = vpop.permute.xlu0 %997 }
 0x215   : > { %v1005_v9 = vpop.permute.xlu2 %1004 }
 0x218   : > { %896 = vadd.xlane.f32.xlu1 %v869_v56  ;;  %v3466_v56 = vadd.s32 4294967288, %v3463_v55 }
 0x220   : > { %904 = vadd.xlane.f32.xlu1 %v873_v51 }
 0x261   : > { %v875_v10 = vpop.xlane.xlu0 %874 }
 0x262   : > { %v3414_v11 = vadd.f32 %v914_v59, %v875_v10 }
 0x263   : > { %v883_v12 = vpop.xlane.xlu1 %882 }
 0x264   : > { %v3416_v13 = vadd.f32 %v940_v61, %v883_v12  ;;  %v879_v14 = vpop.xlane.xlu2 %878  ;;  %1061 = vperm.xlu0 %2757, %v3414_v11  }
 0x265   : > { %v3420_v15 = vadd.f32 %v927_v60, %v879_v14 }
 0x266   : > { %1073 = vperm.xlu2 %2758, %v3416_v13  }
 0x269   : > { %v891_v21 = vpop.xlane.xlu0 %890 }
 0x26a   : > { %v3429_v22 = vadd.f32 %v966_v63, %v891_v21 }
 0x26b   : > { %v887_v16 = vpop.xlane.xlu1 %886 }
 0x26c   : > { %v3422_v18 = vadd.f32 %v953_v0, %v887_v16  ;;  %v895_v19 = vpop.xlane.xlu2 %894  ;;  %1067 = vperm.xlu0 %2757, %v3420_v15  }
 0x26d   : > { %v3425_v17 = vadd.f32 %v979_v6, %v895_v19 }
 0x26e   : > { %1079 = vperm.xlu1 %2759, %v3422_v18  }
 0x26f   : > { %1091 = vperm.xlu2 %2758, %v3425_v17  }
 0x271   : > { %v881_v26 = vpop.xlane.xlu0 %880 }
 0x272   : > { %v3435_v28 = vadd.f32 %v933_v62, %v881_v26 }
 0x273   : > { %v899_v23 = vpop.xlane.xlu1 %898 }
 0x274   : > { %v3431_v24 = vadd.f32 %v992_v35, %v899_v23  ;;  %v903_v25 = vpop.xlane.xlu2 %902  ;;  %1085 = vperm.xlu0 %2757, %v3429_v22  }
 0x275   : > { %v3456_v41 = vadd.f32 %v1005_v9, %v903_v25 }
 0x276   : > { %1097 = vperm.xlu1 %2759, %v3431_v24  }
 0x279   : > { %v901_v36 = vpop.xlane.xlu0 %900 }
 0x27a   : > { %v3452_v39 = vadd.f32 %v998_v8, %v901_v36 }
 0x27b   : > { %v877_v27 = vpop.xlane.xlu1 %876 }
 0x27c   : > { %v3437_v20 = vadd.f32 %v920_v1, %v877_v27  ;;  %v885_v29 = vpop.xlane.xlu2 %884 }
 0x27d   : > { %v3439_v30 = vadd.f32 %v946_v5, %v885_v29 }
 0x27e   : > { %1064 = vperm.xlu2 %2758, %v3437_v20   ;;  %1070 = vperm.xlu1 %2759, %v3435_v28  }
 0x27f   : > { %1076 = vperm.xlu0 %2757, %v3439_v30  }
 0x283   : > { %v893_v31 = vpop.xlane.xlu1 %892 }
 0x284   : > { %v3444_v32 = vadd.f32 %v972_v3, %v893_v31  ;;  %v889_v33 = vpop.xlane.xlu2 %888 }
 0x285   : > { %v3446_v34 = vadd.f32 %v959_v4, %v889_v33 }
 0x286   : > { %1088 = vperm.xlu1 %2759, %v3444_v32  }
 0x287   : > { %1082 = vperm.xlu2 %2758, %v3446_v34  }
 0x28b   : > { %v897_v37 = vpop.xlane.xlu1 %896 }
 0x28c   : > { %v3450_v38 = vadd.f32 %v985_v7, %v897_v37 }
 0x28e   : > { %1094 = vperm.xlu0 %2757, %v3450_v38  }
 0x28f   : > { %1100 = vperm.xlu2 %2758, %v3452_v39  }
 0x293   : > { %v905_v40 = vpop.xlane.xlu1 %904 }
 0x294   : > { %v3458_v42 = vadd.f32 %v1011_v48, %v905_v40 }
 0x296   : > { %1103 = vperm.xlu0 %2757, %v3456_v41   ;;  %1106 = vperm.xlu1 %2759, %v3458_v42  }
 0x2c0   : > { %v1074_v44 = vpop.permute.xlu2 %1073 }
 0x2c1   : > { %v1118_v0 = vperm.slane %v1074_v44, %v3463_v55 }
 0x2c9   : > { %v1092_v49 = vpop.permute.xlu2 %1091 }
 0x2ca   : > { %v1127_v48 = vperm.slane %v1092_v49, %v3463_v55 }
 0x2d6   : > { %v1062_v43 = vpop.permute.xlu0 %1061 }
 0x2d7   : > { %v1110_v62 = vperm.slane %v1062_v43, %v3463_v55 }
 0x2d8   : > { %v1065_v50 = vpop.permute.xlu2 %1064 }
 0x2d9   : > { %v1112_v59 = vperm.slane %v1065_v50, %v3466_v56 }
 0x2db   : > { %v1114_v1 = vsel %vm1113_vm10, %v1112_v59, %v1110_v62 }
 0x2de   : > { %v1068_v46 = vpop.permute.xlu0 %1067 }
 0x2df   : > { %v1115_v60 = vperm.slane %v1068_v46, %v3463_v55 }
 0x2e0   : > { %v1080_v45 = vpop.permute.xlu1 %1079 }
 0x2e1   : > { %v1083_v58 = vpop.permute.xlu2 %1082  ;;  %v1121_v5 = vperm.slane %v1080_v45, %v3463_v55 }
 0x2e2   : > { %v1122_v6 = vperm.slane %v1083_v58, %v3466_v56 }
 0x2e4   : > { %v1123_v14 = vsel %vm1113_vm10, %v1122_v6, %v1121_v5 }
 0x2e6   : > { %v1086_v53 = vpop.permute.xlu0 %1085 }
 0x2e7   : > { %v1124_v8 = vperm.slane %v1086_v53, %v3463_v55 }
 0x2e8   : > { %v1098_v52 = vpop.permute.xlu1 %1097 }
 0x2e9   : > { %v1101_v9 = vpop.permute.xlu2 %1100  ;;  %v1130_v19 = vperm.slane %v1098_v52, %v3463_v55 }
 0x2ea   : > { %v1131_v21 = vperm.slane %v1101_v9, %v3466_v56 }
 0x2ec   : > { %v1132_v36 = vsel %vm1113_vm10, %v1131_v21, %v1130_v19 }
 0x2f0   : > { %v1071_v54 = vpop.permute.xlu1 %1070 }
 0x2f1   : > { %v1077_v57 = vpop.permute.xlu0 %1076  ;;  %v1116_v51 = vperm.slane %v1071_v54, %v3466_v56 }
 0x2f2   : > { %v1119_v61 = vperm.slane %v1077_v57, %v3466_v56 }
 0x2f3   : > { %v1117_v47 = vsel %vm1113_vm10, %v1116_v51, %v1115_v60 }
 0x2f4   : > { %v1137_v2 = vsel %vm1136_vm11, %v1117_v47, %v1114_v1  ;;  %v1120_v35 = vsel %vm1113_vm10, %v1119_v61, %v1118_v0 }
 0x2f5   : > { %v1139_v10 = vsel %vm1138_vm12, %v1120_v35, %v1137_v2 }
 0x2f6   : > { %v1141_v23 = vsel %vm1140_vm13, %v1123_v14, %v1139_v10 }
 0x2f8   : > { %v1089_v63 = vpop.permute.xlu1 %1088 }
 0x2f9   : > { %v1125_v3 = vperm.slane %v1089_v63, %v3466_v56 }
 0x2fb   : > { %v1126_v12 = vsel %vm1113_vm10, %v1125_v3, %v1124_v8 }
 0x2fc   : > { %v1143_v25 = vsel %vm1142_vm14, %v1126_v12, %v1141_v23 }
 0x300   : > { %v1095_v4 = vpop.permute.xlu0 %1094 }
 0x301   : > { %v1128_v7 = vperm.slane %v1095_v4, %v3466_v56 }
 0x303   : > { %v1129_v16 = vsel %vm1113_vm10, %v1128_v7, %v1127_v48 }
 0x304   : > { %v1145_v29 = vsel %vm1144_vm15, %v1129_v16, %v1143_v25 }
 0x305   : > { %v1147_v40 = vsel %vm1146_vm0, %v1132_v36, %v1145_v29 }
 0x308   : > { %v1107_v26 = vpop.permute.xlu1 %1106  ;;  %v1104_v27 = vpop.permute.xlu0 %1103 }
 0x309   : > { %v1134_v31 = vperm.slane %v1107_v26, %v3466_v56  ;;  %v1133_v33 = vperm.slane %v1104_v27, %v3463_v55 }
 0x30b   : > { %v1135_v37 = vsel %vm1113_vm10, %v1134_v31, %v1133_v33 }
 0x30c   : > { %v1149_v43 = vsel %vm1148_vm1, %v1135_v37, %v1147_v40 }
 0x30d   : > { %v1152_v44 = vsel %vm1151_vm2, %v1149_v43, -inf }
 0x30e   : > { %1153 = vmax.xlane.f32.xlu2 %v1152_v44 }
 0x381   : > { %v3500_v45 = vpop.xlane.xlu2 %1153 }
 0x382   : > { %v1161_v46 = vperm.slane %v3500_v45, 5  ;;  %v1156_v49 = vperm.slane %v3500_v45, 0  ;;  %v1157_v54 = vperm.slane %v3500_v45, 1  ;;  %v1158_v62 = vperm.slane %v3500_v45, 2 }
 0x383   : > { %v1159_v0 = vperm.slane %v3500_v45, 3 }
 0x384   : > { %v1182_v52 = vsub.f32 %v3425_v17, %v1161_v46  ;;  %v1173_v50 = vsub.f32 %v3437_v20, %v1156_v49  ;;  %v1172_v53 = vsub.f32 %v3414_v11, %v1156_v49  ;;  %v1175_v59 = vsub.f32 %v3435_v28, %v1157_v54 }
 0x385   : > { %v1174_v60 = vsub.f32 %v3420_v15, %v1157_v54  ;;  %v1177_v28 = vsub.f32 %v3439_v30, %v1158_v62  ;;  %v1176_v15 = vsub.f32 %v3416_v13, %v1158_v62  ;;  %v1179_v3 = vsub.f32 %v3446_v34, %v1159_v0 }
 0x386   : > { %v1208_v57 = vmul.f32 1.442695, %v1182_v52  ;;  %v1190_v58 = vmul.f32 1.442695, %v1173_v50  ;;  %v1188_v51 = vmul.f32 1.442695, %v1172_v53  ;;  %v1178_v30 = vsub.f32 %v3422_v18, %v1159_v0 }
 0x387   : > { %v1194_v61 = vmul.f32 1.442695, %v1175_v59  ;;  %v1192_v20 = vmul.f32 1.442695, %v1174_v60  ;;  %v1198_v63 = vmul.f32 1.442695, %v1177_v28 }
 0x388   : > { %2774 = vpow2.f32 %v1208_v57  ;;  %v1196_v1 = vmul.f32 1.442695, %v1176_v15  ;;  %v1202_v4 = vmul.f32 1.442695, %v1179_v3  ;;  %v1160_v13 = vperm.slane %v3500_v45, 4 }
 0x389   : > { %2776 = vpow2.f32 %v1190_v58  ;;  %v1200_v5 = vmul.f32 1.442695, %v1178_v30  ;;  %v1162_v18 = vperm.slane %v3500_v45, 6 }
 0x38a   : > { %2778 = vpow2.f32 %v1188_v51  ;;  %v1181_v8 = vsub.f32 %v3444_v32, %v1160_v13  ;;  %v1180_v34 = vsub.f32 %v3429_v22, %v1160_v13  ;;  %v1183_v32 = vsub.f32 %v3450_v38, %v1161_v46 }
 0x38b   : > { %2780 = vpow2.f32 %v1194_v61  ;;  %v1184_v14 = vsub.f32 %v3431_v24, %v1162_v18  ;;  %v1163_v22 = vperm.slane %v3500_v45, 7  ;;  %v1185_v24 = vsub.f32 %v3452_v39, %v1162_v18 }
 0x38c   : > { %2782 = vpow2.f32 %v1192_v20  ;;  %v1206_v48 = vmul.f32 1.442695, %v1181_v8  ;;  %v1204_v9 = vmul.f32 1.442695, %v1180_v34  ;;  %v1210_v19 = vmul.f32 1.442695, %v1183_v32 }
 0x38d   : > { %2784 = vpow2.f32 %v1198_v63  ;;  %v1212_v16 = vmul.f32 1.442695, %v1184_v14  ;;  %v1186_v25 = vsub.f32 %v3456_v41, %v1163_v22  ;;  %v1214_v38 = vmul.f32 1.442695, %v1185_v24 }
 0x38e   : > { %v3511_v17 = vpop.eup %2774  ;;  %2786 = vpow2.f32 %v1196_v1  ;;  %v1187_v31 = vsub.f32 %v3458_v42, %v1163_v22 }
 0x38f   : > { %v3513_v47 = vpop.eup %2776  ;;  %1267 = vperm.xlu2 %2758, %v3511_v17   ;;  %2788 = vpow2.f32 %v1202_v4  ;;  %v1216_v26 = vmul.f32 1.442695, %v1186_v25 }
 0x390   : > { %v3516_v11 = vpop.eup %2778  ;;  %1240 = vperm.xlu1 %2759, %v3513_v47   ;;  %2790 = vpow2.f32 %v1200_v5  ;;  %v1218_v33 = vmul.f32 1.442695, %v1187_v31 }
 0x391   : > { %1237 = vperm.xlu0 %2757, %v3516_v11   ;;  %v3523_v2 = vpop.eup %2780  ;;  %2792 = vpow2.f32 %v1206_v48 }
 0x392   : > { %v3525_v35 = vpop.eup %2782  ;;  %2794 = vpow2.f32 %v1204_v9 }
 0x393   : > { %v3532_v6 = vpop.eup %2784  ;;  %2796 = vpow2.f32 %v1212_v16 }
 0x394   : > { %v3534_v7 = vpop.eup %2786  ;;  %2798 = vpow2.f32 %v1210_v19 }
 0x395   : > { %v3541_v10 = vpop.eup %2788  ;;  %2800 = vpow2.f32 %v1216_v26 }
 0x396   : > { %v3543_v12 = vpop.eup %2790  ;;  %2802 = vpow2.f32 %v1214_v38 }
 0x397   : > { %v3550_v21 = vpop.eup %2792  ;;  %2804 = vpow2.f32 %v1218_v33 }
 0x398   : > { %1246 = vperm.xlu1 %2759, %v3523_v2   ;;  %v3552_v23 = vpop.eup %2794 }
 0x399   : > { %1243 = vperm.xlu0 %2757, %v3525_v35   ;;  %v3558_v27 = vpop.eup %2796 }
 0x39a   : > { %v3560_v29 = vpop.eup %2798 }
 0x39b   : > { %v3565_v36 = vpop.eup %2800 }
 0x39c   : > { %v3567_v41 = vpop.eup %2802 }
 0x39d   : > { %v3571_v39 = vpop.eup %2804 }
 0x3a0   : > { %1252 = vperm.xlu1 %2759, %v3532_v6  }
 0x3a1   : > { %1249 = vperm.xlu0 %2757, %v3534_v7  }
 0x3a8   : > { %1258 = vperm.xlu1 %2759, %v3541_v10  }
 0x3a9   : > { %1255 = vperm.xlu0 %2757, %v3543_v12  }
 0x3b0   : > { %1264 = vperm.xlu1 %2759, %v3550_v21  }
 0x3b1   : > { %1261 = vperm.xlu0 %2757, %v3552_v23  }
 0x3b8   : > { %1273 = vperm.xlu1 %2759, %v3558_v27  }
 0x3b9   : > { %1270 = vperm.xlu0 %2757, %v3560_v29  }
 0x3c0   : > { %1279 = vperm.xlu1 %2759, %v3565_v36  }
 0x3c1   : > { %1276 = vperm.xlu0 %2757, %v3567_v41  }
 0x3c9   : > { %1282 = vperm.xlu0 %2757, %v3571_v39  }
 0x3e9   : > { %v1268_v15 = vpop.permute.xlu2 %1267 }
 0x3ea   : > { %v1299_v13 = vperm.slane %v1268_v15, %v3463_v55 }
 0x402   : > { %v1241_v37 = vpop.permute.xlu1 %1240 }
 0x403   : > { %v1238_v40 = vpop.permute.xlu0 %1237  ;;  %v1285_v61 = vperm.slane %v1241_v37, %v3466_v56 }
 0x404   : > { %v1284_v62 = vperm.slane %v1238_v40, %v3463_v55 }
 0x406   : > { %v1286_v5 = vsel %vm1113_vm10, %v1285_v61, %v1284_v62 }
 0x40a   : > { %v1247_v43 = vpop.permute.xlu1 %1246 }
 0x40b   : > { %v1244_v44 = vpop.permute.xlu0 %1243  ;;  %v1288_v57 = vperm.slane %v1247_v43, %v3466_v56 }
 0x40c   : > { %v1287_v58 = vperm.slane %v1244_v44, %v3463_v55 }
 0x40e   : > { %v1289_v1 = vsel %vm1113_vm10, %v1288_v57, %v1287_v58 }
 0x40f   : > { %v1308_v34 = vsel %vm1136_vm11, %v1289_v1, %v1286_v5 }
 0x412   : > { %v1253_v45 = vpop.permute.xlu1 %1252 }
 0x413   : > { %v1250_v42 = vpop.permute.xlu0 %1249  ;;  %v1291_v51 = vperm.slane %v1253_v45, %v3466_v56 }
 0x414   : > { %v1290_v59 = vperm.slane %v1250_v42, %v3463_v55 }
 0x416   : > { %v1292_v30 = vsel %vm1113_vm10, %v1291_v51, %v1290_v59 }
 0x417   : > { %v1309_v14 = vsel %vm1138_vm12, %v1292_v30, %v1308_v34 }
 0x41a   : > { %v1259_v46 = vpop.permute.xlu1 %1258 }
 0x41b   : > { %v1256_v49 = vpop.permute.xlu0 %1255  ;;  %v1294_v20 = vperm.slane %v1259_v46, %v3466_v56 }
 0x41c   : > { %v1293_v28 = vperm.slane %v1256_v49, %v3463_v55 }
 0x41e   : > { %v1295_v8 = vsel %vm1113_vm10, %v1294_v20, %v1293_v28 }
 0x41f   : > { %v1310_v16 = vsel %vm1140_vm13, %v1295_v8, %v1309_v14 }
 0x422   : > { %v1265_v50 = vpop.permute.xlu1 %1264 }
 0x423   : > { %v1262_v52 = vpop.permute.xlu0 %1261  ;;  %v1297_v63 = vperm.slane %v1265_v50, %v3466_v56 }
 0x424   : > { %v1296_v0 = vperm.slane %v1262_v52, %v3463_v55 }
 0x426   : > { %v1298_v48 = vsel %vm1113_vm10, %v1297_v63, %v1296_v0 }
 0x427   : > { %v1311_v25 = vsel %vm1142_vm14, %v1298_v48, %v1310_v16 }
 0x42a   : > { %v1274_v54 = vpop.permute.xlu1 %1273 }
 0x42b   : > { %v1271_v53 = vpop.permute.xlu0 %1270  ;;  %v1302_v18 = vperm.slane %v1274_v54, %v3463_v55 }
 0x42c   : > { %v1300_v3 = vperm.slane %v1271_v53, %v3466_v56 }
 0x42e   : > { %v1301_v32 = vsel %vm1113_vm10, %v1300_v3, %v1299_v13 }
 0x42f   : > { %v1312_v38 = vsel %vm1144_vm15, %v1301_v32, %v1311_v25 }
 0x432   : > { %v1280_v9 = vpop.permute.xlu1 %1279 }
 0x433   : > { %v1277_v60 = vpop.permute.xlu0 %1276  ;;  %v1305_v24 = vperm.slane %v1280_v9, %v3463_v55 }
 0x434   : > { %v1303_v4 = vperm.slane %v1277_v60, %v3466_v56 }
 0x436   : > { %v1304_v22 = vsel %vm1113_vm10, %v1303_v4, %v1302_v18 }
 0x437   : > { %v1313_v33 = vsel %vm1146_vm0, %v1304_v22, %v1312_v38 }
 0x43b   : > { %v1283_v19 = vpop.permute.xlu0 %1282 }
 0x43c   : > { %v1306_v26 = vperm.slane %v1283_v19, %v3466_v56 }
 0x43e   : > { %v1307_v31 = vsel %vm1113_vm10, %v1306_v26, %v1305_v24 }
 0x43f   : > { %v1314_v37 = vsel %vm1148_vm1, %v1307_v31, %v1313_v33  ;;  %v2416_v31 = vld [vmem:[#allocation10 + $0xe0] sm:$0xf]  ;;  %v2608_v33 = vld [vmem:[#allocation10 + $0xec] sm:$0xf0] }
 0x440   : > { %v1316_v40 = vsel %vm1151_vm2, %v1314_v37, 0.0  ;;  %v2606_v37 = vld [vmem:[#allocation10 + $0xe4] sm:$0xf] }
 0x441   : > { %1317 = vadd.xlane.f32.xlu1 %v1316_v40 }
 0x4b4   : > { %v1318_v43 = vpop.xlane.xlu1 %1317 }
 0x4b5   : > { %2806 = vrcp.f32 %v1318_v43  ;;  %v2417_v43 = vor.u32 %v2608_v33, %v2416_v31  ;;  %v2354_v33 = vld [vmem:[#allocation10 + $0x70] sm:$0xf0] }
 0x4b7   : > { %1680 = vmatpush.bf16.msra.mxu3 %v2417_v43  ;;  %v2593_v43 = vld [vmem:[#allocation10 + $0x74] sm:$0xf0] }
 0x4bb   : > { %v2807_v44 = vpop.eup %2806 }
 0x4bc   : > { %v1326_v45 = vperm.slane %v2807_v44, 5  ;;  %v1321_v42 = vperm.slane %v2807_v44, 0  ;;  %v1322_v46 = vperm.slane %v2807_v44, 1  ;;  %v1325_v3 = vperm.slane %v2807_v44, 4 }
 0x4bd   : > { %v1327_v5 = vperm.slane %v2807_v44, 6  ;;  %v1328_v18 = vperm.slane %v2807_v44, 7 }
 0x4be   : > { %v1347_v49 = vmul.f32 %v3511_v17, %v1326_v45  ;;  %v1348_v52 = vmul.f32 %v3560_v29, %v1326_v45  ;;  %v1337_v50 = vmul.f32 %v3516_v11, %v1321_v42  ;;  %v1338_v53 = vmul.f32 %v3513_v47, %v1321_v42  ;;  %v2424_v45 = vld [vmem:[#allocation10 + $0xe8] sm:$0xf]  ;;  %v2609_v42 = vld [vmem:[#allocation10 + $0xf4] sm:$0xf0] }
 0x4bf   : > { %v1339_v58 = vmul.f32 %v3525_v35, %v1322_v46  ;;  %v1340_v61 = vmul.f32 %v3523_v2, %v1322_v46  ;;  %v1323_v17 = vperm.slane %v2807_v44, 2  ;;  %v1324_v35 = vperm.slane %v2807_v44, 3  ;;  %v2418_v44 = vld [vmem:[#allocation10 + $0xf0] sm:$0xf0] }
 0x4c0   : > { %v1358_v54 = vpack.c.bf16 %v1348_v52, %v1347_v49  ;;  %v1353_v57 = vpack.c.bf16 %v1338_v53, %v1337_v50  ;;  %v2421_v46 = vor.u32 %v2606_v37, %v2418_v44  ;;  %v2425_v49 = vor.u32 %v2609_v42, %v2424_v45  ;;  %v2607_v52 = vld [vmem:[#allocation10 + $0xec] sm:$0xf]  ;;  %v2426_v50 = vld [vmem:[#allocation10 + $0xf8] sm:$0xf0]  ;;  %v2400_v53 = vld [vmem:[#allocation10 + $0xc0] sm:$0xf] }
 0x4c1   : > { %v1354_v62 = vpack.c.bf16 %v1340_v61, %v1339_v58  ;;  %v1341_v29 = vmul.f32 %v3534_v7, %v1323_v17  ;;  %v1342_v11 = vmul.f32 %v3532_v6, %v1323_v17  ;;  %v1343_v63 = vmul.f32 %v3543_v12, %v1324_v35  ;;  %v2604_v58 = vld [vmem:[#allocation10 + $0xcc] sm:$0xf0]  ;;  %v2605_v17 = vld [vmem:[#allocation10 + $0xd4] sm:$0xf0]  ;;  %v2360_v37 = vld [vmem:[#allocation10 + $0x68] sm:$0xf] }
 0x4c2   : > { %v1384_v51 = vunpack.c.l.b16 %v1358_v54  ;;  %v1375_v59 = vunpack.c.h.b16 %v1353_v57  ;;  %v1374_v60 = vunpack.c.l.b16 %v1353_v57  ;;  %v1344_v2 = vmul.f32 %v3541_v10, %v1324_v35  ;;  %1693 = vmatpush.bf16.msrb.mxu2 %v2421_v46  ;;  %1706 = vmatpush.bf16.msrb.mxu0 %v2425_v49  ;;  %v2591_v45 = vld [vmem:[#allocation10 + $0x6c] sm:$0xf]  ;;  %v2362_v42 = vld [vmem:[#allocation10 + $0x78] sm:$0xf0] }
 0x4c3   : > { %v1377_v20 = vunpack.c.h.b16 %v1354_v62  ;;  %v1376_v47 = vunpack.c.l.b16 %v1354_v62  ;;  %v1355_v28 = vpack.c.bf16 %v1342_v11, %v1341_v29  ;;  %v1345_v7 = vmul.f32 %v3552_v23, %v1325_v3  ;;  %v2408_v62 = vld [vmem:[#allocation10 + $0xc8] sm:$0xf]  ;;  %v2410_v11 = vld [vmem:[#allocation10 + $0xd8] sm:$0xf0] }
 0x4c4   : > { %1421 = vperm.xlu1 %2759, %v1384_v51   ;;  %1394 = vperm.xlu0 %2757, %v1375_v59   ;;  %v1356_v1 = vpack.c.bf16 %v1344_v2, %v1343_v63  ;;  %v1346_v6 = vmul.f32 %v3550_v21, %v1325_v3  ;;  %v1349_v12 = vmul.f32 %v3558_v27, %v1327_v5  ;;  %v1385_v14 = vunpack.c.h.b16 %v1358_v54  ;;  %v2602_v51 = vld [vmem:[#allocation10 + $0xc4] sm:$0xf]  ;;  %v2402_v59 = vld [vmem:[#allocation10 + $0xd0] sm:$0xf0]  ;;  %v2392_v2 = vld [vmem:[#allocation10 + $0xa8] sm:$0xf] }
 0x4c5   : > { %1391 = vperm.xlu2 %2758, %v1374_v60   ;;  %v1379_v15 = vunpack.c.h.b16 %v1355_v28  ;;  %v1378_v0 = vunpack.c.l.b16 %v1355_v28  ;;  %v1350_v10 = vmul.f32 %v3567_v41, %v1327_v5  ;;  %v1351_v23 = vmul.f32 %v3565_v36, %v1328_v18  ;;  %v2600_v28 = vld [vmem:[#allocation10 + $0xac] sm:$0xf0]  ;;  %v2386_v63 = vld [vmem:[#allocation10 + $0xb0] sm:$0xf0]  ;;  %v2599_v3 = vld [vmem:[#allocation10 + $0xac] sm:$0xf] }
 0x4c6   : > { %v1381_v30 = vunpack.c.h.b16 %v1356_v1  ;;  %v1380_v4 = vunpack.c.l.b16 %v1356_v1  ;;  %v1357_v13 = vpack.c.bf16 %v1346_v6, %v1345_v7  ;;  %v1352_v21 = vmul.f32 %v3571_v39, %v1328_v18  ;;  %v2601_v1 = vld [vmem:[#allocation10 + $0xb4] sm:$0xf0]  ;;  %v2594_v5 = vld [vmem:[#allocation10 + $0x84] sm:$0xf]  ;;  %v2595_v18 = vld [vmem:[#allocation10 + $0x8c] sm:$0xf] }
 0x4c7   : > { %v1359_v48 = vpack.c.bf16 %v1350_v10, %v1349_v12  ;;  %v2429_v57 = vor.u32 %v2607_v52, %v2426_v50  ;;  %v2401_v60 = vor.u32 %v2604_v58, %v2400_v53  ;;  %v2405_v61 = vor.u32 %v2602_v51, %v2402_v59  ;;  %v2370_v10 = vld [vmem:[#allocation10 + $0x90] sm:$0xf0]  ;;  %v2336_v58 = vld [vmem:[#allocation10 + $0x40] sm:$0xf]  ;;  %v2588_v51 = vld [vmem:[#allocation10 + $0x4c] sm:$0xf0] }
 0x4c8   : > { %v1383_v8 = vunpack.c.h.b16 %v1357_v13  ;;  %v1382_v34 = vunpack.c.l.b16 %v1357_v13  ;;  %v1360_v32 = vpack.c.bf16 %v1352_v21, %v1351_v23  ;;  %v2409_v29 = vor.u32 %v2605_v17, %v2408_v62  ;;  %v2596_v13 = vld [vmem:[#allocation10 + $0x8c] sm:$0xf0]  ;;  %v2586_v59 = vld [vmem:[#allocation10 + $0x44] sm:$0xf]  ;;  %v2344_v62 = vld [vmem:[#allocation10 + $0x48] sm:$0xf] }
 0x4c9   : > { %v1386_v9 = vunpack.c.l.b16 %v1359_v48  ;;  %v1387_v22 = vunpack.c.h.b16 %v1359_v48  ;;  %1719 = vmatpush.bf16.msrb.mxu1 %v2429_v57  ;;  %1681 = vmatpush.bf16.msra.mxu3 %v2401_v60  ;;  %v2393_v6 = vor.u32 %v2601_v1, %v2392_v2  ;;  %v2597_v48 = vld [vmem:[#allocation10 + $0x94] sm:$0xf0]  ;;  %v2373_v21 = vor.u32 %v2594_v5, %v2370_v10 }
 0x4ca   : > { %v1388_v16 = vunpack.c.l.b16 %v1360_v32  ;;  %v1389_v27 = vunpack.c.h.b16 %v1360_v32  ;;  %1694 = vmatpush.bf16.msrb.mxu2 %v2405_v61  ;;  %1707 = vmatpush.bf16.msrb.mxu0 %v2409_v29  ;;  %v2352_v32 = vld [vmem:[#allocation10 + $0x60] sm:$0xf]  ;;  %v2365_v61 = vor.u32 %v2591_v45, %v2362_v42  ;;  %v2589_v17 = vld [vmem:[#allocation10 + $0x54] sm:$0xf0] }
 0x4cb   : > { %v2345_v2 = vor.u32 %v2589_v17, %v2344_v62  ;;  %v2304_v45 = vld [vmem:[#allocation10] sm:$0xf]  ;;  %v2640_v62 = vld [vmem:[#allocation11 + $0xf0] sm:$0xff] }
 0x4cc   : > { %1400 = vperm.xlu0 %2757, %v1377_v20   ;;  %v2603_v20 = vld [vmem:[#allocation10 + $0xcc] sm:$0xf]  ;;  %v2765_v17 = vld [vmem:[%s3765_s26] ss:$0 sm:$0xff] }
 0x4cd   : > { %1397 = vperm.xlu2 %2758, %v1376_v47   ;;  %v2384_v47 = vld [vmem:[#allocation10 + $0xa0] sm:$0xf]  ;;  %v2413_v35 = vor.u32 %v2603_v20, %v2410_v11  ;;  %v2587_v11 = vld [vmem:[#allocation10 + $0x4c] sm:$0xf] }
 0x4ce   : > { %1708 = vmatpush.bf16.msrb.mxu0 %v2393_v6 }
 0x4cf   : > { %1720 = vmatpush.bf16.msrb.mxu1 %v2413_v35  ;;  %v2337_v35 = vor.u32 %v2588_v51, %v2336_v58  ;;  %v2579_v58 = vld [vmem:[#allocation10 + $0xc] sm:$0xf] }
 0x4d4   : > { %1406 = vperm.xlu0 %2757, %v1379_v15   ;;  %v2598_v15 = vld [vmem:[#allocation10 + $0xa4] sm:$0xf] }
 0x4d5   : > { %1403 = vperm.xlu2 %2758, %v1378_v0   ;;  %v2385_v0 = vor.u32 %v2600_v28, %v2384_v47  ;;  %v2389_v7 = vor.u32 %v2598_v15, %v2386_v63  ;;  %v2346_v47 = vld [vmem:[#allocation10 + $0x58] sm:$0xf0] }
 0x4d7   : > { %1682 = vmatpush.bf16.msra.mxu3 %v2385_v0  ;;  %1695 = vmatpush.bf16.msrb.mxu2 %v2389_v7 }
 0x4db   : > { %1696 = vmatpush.bf16.msrb.mxu2 %v2373_v21 }
 0x4dc   : > { %1412 = vperm.xlu0 %2757, %v1381_v30   ;;  %v2394_v30 = vld [vmem:[#allocation10 + $0xb8] sm:$0xf0] }
 0x4dd   : > { %1409 = vperm.xlu2 %2758, %v1380_v4   ;;  %v2368_v4 = vld [vmem:[#allocation10 + $0x80] sm:$0xf]  ;;  %v2397_v12 = vor.u32 %v2599_v3, %v2394_v30  ;;  %v2349_v30 = vor.u32 %v2587_v11, %v2346_v47 }
 0x4de   : > { %v2369_v23 = vor.u32 %v2596_v13, %v2368_v4  ;;  %v2816_v11 = vld [vmem:[%s3299_s14] sm:$0xff] }
 0x4df   : > { %1721 = vmatpush.bf16.msrb.mxu1 %v2397_v12 }
 0x4e0   : > { %1683 = vmatpush.bf16.msra.mxu3 %v2369_v23 }
 0x4e4   : > { %1418 = vperm.xlu0 %2757, %v1383_v8  }
 0x4e5   : > { %1415 = vperm.xlu2 %2758, %v1382_v34   ;;  %v2376_v34 = vld [vmem:[#allocation10 + $0x88] sm:$0xf] }
 0x4ec   : > { %1427 = vperm.xlu0 %2757, %v1386_v9   ;;  %v2378_v9 = vld [vmem:[#allocation10 + $0x98] sm:$0xf0] }
 0x4ed   : > { %1424 = vperm.xlu2 %2758, %v1385_v14   ;;  %v2377_v14 = vor.u32 %v2597_v48, %v2376_v34  ;;  %v2381_v31 = vor.u32 %v2595_v18, %v2378_v9 }
 0x4ef   : > { %1709 = vmatpush.bf16.msrb.mxu0 %v2377_v14  ;;  %1722 = vmatpush.bf16.msrb.mxu1 %v2381_v31  ;;  %v2322_v31 = vld [vmem:[#allocation10 + $0x30] sm:$0xf0] }
 0x4f3   : > { %1723 = vmatpush.bf16.msrb.mxu1 %v2365_v61  ;;  %v2625_v61 = vld [vmem:[#allocation11 + $0x78] sm:$0xff] }
 0x4f4   : > { %1433 = vperm.xlu0 %2757, %v1388_v16   ;;  %v2592_v16 = vld [vmem:[#allocation10 + $0x6c] sm:$0xf0] }
 0x4f5   : > { %1430 = vperm.xlu2 %2758, %v1387_v22   ;;  %v2590_v22 = vld [vmem:[#allocation10 + $0x64] sm:$0xf]  ;;  %v2353_v50 = vor.u32 %v2592_v16, %v2352_v32  ;;  %v2320_v32 = vld [vmem:[#allocation10 + $0x20] sm:$0xf]  ;;  %v2584_v16 = vld [vmem:[#allocation10 + $0x2c] sm:$0xf0] }
 0x4f6   : > { %v2357_v57 = vor.u32 %v2590_v22, %v2354_v33  ;;  %v2582_v22 = vld [vmem:[#allocation10 + $0x24] sm:$0xf]  ;;  %v2328_v33 = vld [vmem:[#allocation10 + $0x28] sm:$0xf] }
 0x4f7   : > { %1684 = vmatpush.bf16.msra.mxu3 %v2353_v50  ;;  %1724 = vmatpush.bf16.msrb.mxu1 %v2349_v30  ;;  %v2637_v30 = vld [vmem:[#allocation11 + $0xd8] sm:$0xff] }
 0x4f8   : > { %1697 = vmatpush.bf16.msrb.mxu2 %v2357_v57  ;;  %v2312_v57 = vld [vmem:[#allocation10 + $0x8] sm:$0xf] }
 0x4fb   : > { %1685 = vmatpush.bf16.msra.mxu3 %v2337_v35  ;;  %v2639_v35 = vld [vmem:[#allocation11 + $0xe8] sm:$0xff] }
 0x4fd   : > { %1436 = vperm.xlu2 %2758, %v1389_v27  }
 0x51f   : > { %v3622_v41 = vpop.permute.xlu2 %1391 }
 0x527   : > { %v3624_v19 = vpop.permute.xlu2 %1397 }
 0x528   : > { %v1441_v46 = vperm.slane %v3624_v19, %v3463_v55  ;;  %v1438_v19 = vperm.slane %v3622_v41, %v3463_v55 }
 0x52f   : > { %v3626_v25 = vpop.permute.xlu2 %1403 }
 0x536   : > { %v3628_v24 = vpop.permute.xlu0 %1394 }
 0x537   : > { %v3630_v36 = vpop.permute.xlu2 %1409  ;;  %v1439_v49 = vperm.slane %v3628_v24, %v3466_v56  ;;  %v1444_v24 = vperm.slane %v3626_v25, %v3463_v55 }
 0x538   : > { %v1447_v20 = vperm.slane %v3630_v36, %v3463_v55  ;;  %v1422_v36 = vpop.permute.xlu1 %1421 }
 0x539   : > { %v1440_v41 = vsel %vm1113_vm10, %v1439_v49, %v1438_v19  ;;  %v1453_v5 = vperm.slane %v1422_v36, %v3463_v55  ;;  %v2578_v49 = vld [vmem:[#allocation10 + $0x4] sm:$0xf]  ;;  %v2633_v19 = vld [vmem:[#allocation11 + $0xb8] sm:$0xff] }
 0x53a   : > { %v2638_v36 = vld [vmem:[#allocation11 + $0xe0] sm:$0xff] }
 0x53e   : > { %v3632_v39 = vpop.permute.xlu0 %1400 }
 0x53f   : > { %v3634_v26 = vpop.permute.xlu2 %1415  ;;  %v1442_v44 = vperm.slane %v3632_v39, %v3466_v56  ;;  %v2361_v39 = vor.u32 %v2593_v43, %v2360_v37  ;;  %v2325_v37 = vor.u32 %v2582_v22, %v2322_v31  ;;  %v2583_v43 = vld [vmem:[#allocation10 + $0x2c] sm:$0xf]  ;;  %v2618_v31 = vld [vmem:[#allocation11 + $0x40] sm:$0xff] }
 0x540   : > { %v1450_v25 = vperm.slane %v3634_v26, %v3463_v55 }
 0x541   : > { %v1443_v29 = vsel %vm1113_vm10, %v1442_v44, %v1441_v46  ;;  %1710 = vmatpush.bf16.msrb.mxu0 %v2361_v39  ;;  %v2330_v44 = vld [vmem:[#allocation10 + $0x38] sm:$0xf0]  ;;  %v2580_v46 = vld [vmem:[#allocation10 + $0xc] sm:$0xf0]  ;;  %v2581_v39 = vld [vmem:[#allocation10 + $0x14] sm:$0xf0] }
 0x542   : > { %v1462_v0 = vsel %vm1136_vm11, %v1443_v29, %v1440_v41  ;;  %v2333_v42 = vor.u32 %v2583_v43, %v2330_v44  ;;  %v2305_v50 = vor.u32 %v2580_v46, %v2304_v45  ;;  %v2313_v51 = vor.u32 %v2581_v39, %v2312_v57 }
 0x544   : > { %1725 = vmatpush.bf16.msrb.mxu1 %v2333_v42 }
 0x545   : > { %1711 = vmatpush.bf16.msrb.mxu0 %v2345_v2  ;;  %v2630_v2 = vld [vmem:[#allocation11 + $0xa0] sm:$0xff] }
 0x546   : > { %v3636_v38 = vpop.permute.xlu0 %1406 }
 0x547   : > { %v3640_v54 = vpop.permute.xlu2 %1424  ;;  %v1445_v52 = vperm.slane %v3636_v38, %v3466_v56 }
 0x548   : > { %v1454_v7 = vperm.slane %v3640_v54, %v3466_v56 }
 0x549   : > { %v1446_v28 = vsel %vm1113_vm10, %v1445_v52, %v1444_v24  ;;  %v2306_v52 = vld [vmem:[#allocation10 + $0x10] sm:$0xf0] }
 0x54a   : > { %v1463_v26 = vsel %vm1138_vm12, %v1446_v28, %v1462_v0  ;;  %v1455_v34 = vsel %vm1113_vm10, %v1454_v7, %v1453_v5  ;;  %v2631_v28 = vld [vmem:[#allocation11 + $0xa8] sm:$0xff]  ;;  %v2622_v7 = vld [vmem:[#allocation11 + $0x60] sm:$0xff]  ;;  %v2621_v5 = vld [vmem:[#allocation11 + $0x58] sm:$0xff] }
 0x54b   : > { %v2615_v0 = vld [vmem:[#allocation11 + $0x28] sm:$0xff] }
 0x54e   : > { %v3638_v40 = vpop.permute.xlu0 %1412 }
 0x54f   : > { %v3644_v27 = vpop.permute.xlu2 %1430  ;;  %v1448_v53 = vperm.slane %v3638_v40, %v3466_v56  ;;  %v2338_v40 = vld [vmem:[#allocation10 + $0x50] sm:$0xf0] }
 0x550   : > { %v2341_v63 = vor.u32 %v2586_v59, %v2338_v40  ;;  %v1457_v4 = vperm.slane %v3644_v27, %v3466_v56  ;;  %v2321_v27 = vor.u32 %v2584_v16, %v2320_v32  ;;  %v2314_v59 = vld [vmem:[#allocation10 + $0x18] sm:$0xf0]  ;;  %v2632_v40 = vld [vmem:[#allocation11 + $0xb0] sm:$0xff] }
 0x551   : > { %v1449_v15 = vsel %vm1113_vm10, %v1448_v53, %v1447_v20  ;;  %v2309_v53 = vor.u32 %v2578_v49, %v2306_v52  ;;  %v2317_v24 = vor.u32 %v2579_v58, %v2314_v59 }
 0x552   : > { %v1464_v6 = vsel %vm1140_vm13, %v1449_v15, %v1463_v26  ;;  %1698 = vmatpush.bf16.msrb.mxu2 %v2341_v63  ;;  %1686 = vmatpush.bf16.msra.mxu3 %v2321_v27  ;;  %v2616_v15 = vld [vmem:[#allocation11 + $0x30] sm:$0xff]  ;;  %v2614_v26 = vld [vmem:[#allocation11 + $0x20] sm:$0xff] }
 0x553   : > { %1726 = vmatpush.bf16.msrb.mxu1 %v2317_v24  ;;  %v2624_v63 = vld [vmem:[#allocation11 + $0x70] sm:$0xff]  ;;  %v2610_v27 = vld [vmem:[#allocation11] sm:$0xff] }
 0x556   : > { %v3642_v8 = vpop.permute.xlu0 %1418  ;;  %1699 = vmatpush.bf16.msrb.mxu2 %v2325_v37  ;;  %1687 = vmatpush.bf16.msra.mxu3 %v2305_v50 }
 0x557   : > { %v1451_v38 = vperm.slane %v3642_v8, %v3466_v56  ;;  %v1437_v13 = vpop.permute.xlu2 %1436 }
 0x558   : > { %v1460_v54 = vperm.slane %v1437_v13, %v3466_v56  ;;  %v2585_v56 = vld [vmem:[#allocation10 + $0x34] sm:$0xf0] }
 0x559   : > { %v1452_v1 = vsel %vm1113_vm10, %v1451_v38, %v1450_v25  ;;  %v2641_v38 = vld [vmem:[#allocation11 + $0xf8] sm:$0xff] }
 0x55a   : > { %v1465_v8 = vsel %vm1142_vm14, %v1452_v1, %v1464_v6  ;;  %1700 = vmatpush.bf16.msrb.mxu2 %v2309_v53  ;;  %2067 = vmatpush.bf16.msra.mxu1 %v2641_v38  ;;  %v2623_v1 = vld [vmem:[#allocation11 + $0x68] sm:$0xff]  ;;  %v2628_v6 = vld [vmem:[#allocation11 + $0x90] sm:$0xff]  ;;  %v2613_v13 = vld [vmem:[#allocation11 + $0x18] sm:$0xff] }
 0x55b   : > { %v1466_v18 = vsel %vm1144_vm15, %v1455_v34, %v1465_v8  ;;  %v2627_v8 = vld [vmem:[#allocation11 + $0x88] sm:$0xff]  ;;  %v2620_v34 = vld [vmem:[#allocation11 + $0x50] sm:$0xff] }
 0x55e   : > { %v1428_v60 = vpop.permute.xlu0 %1427  ;;  %2068 = vmatpush.bf16.msra.mxu1 %v2640_v62 }
 0x55f   : > { %v1456_v3 = vperm.slane %v1428_v60, %v3463_v55  ;;  %v2617_v60 = vld [vmem:[#allocation11 + $0x38] sm:$0xff] }
 0x560   : > { %2028 = vmatpush.bf16.msrb.mxu3 %v2617_v60 }
 0x561   : > { %v1458_v12 = vsel %vm1113_vm10, %v1457_v4, %v1456_v3  ;;  %v2629_v3 = vld [vmem:[#allocation11 + $0x98] sm:$0xff]  ;;  %v2636_v4 = vld [vmem:[#allocation11 + $0xd0] sm:$0xff] }
 0x562   : > { %v1467_v23 = vsel %vm1146_vm0, %v1458_v12, %v1466_v18  ;;  %2069 = vmatpush.bf16.msra.mxu1 %v2639_v35  ;;  %v2635_v12 = vld [vmem:[#allocation11 + $0xc8] sm:$0xff] }
 0x563   : > { %v2611_v18 = vld [vmem:[#allocation11 + $0x8] sm:$0xff] }
 0x564   : > { %2029 = vmatpush.bf16.msrb.mxu3 %v2616_v15 }
 0x566   : > { %v1434_v10 = vpop.permute.xlu0 %1433  ;;  %2070 = vmatpush.bf16.msra.mxu1 %v2638_v36 }
 0x567   : > { %v1459_v48 = vperm.slane %v1434_v10, %v3463_v55  ;;  %v2329_v55 = vor.u32 %v2585_v56, %v2328_v33  ;;  %v2612_v10 = vld [vmem:[#allocation11 + $0x10] sm:$0xff] }
 0x568   : > { %2030 = vmatpush.bf16.msrb.mxu3 %v2615_v0 }
 0x569   : > { %v1461_v9 = vsel %vm1113_vm10, %v1460_v54, %v1459_v48  ;;  %1712 = vmatpush.bf16.msrb.mxu0 %v2329_v55  ;;  %v2626_v54 = vld [vmem:[#allocation11 + $0x80] sm:$0xff] }
 0x56a   : > { %v1468_v21 = vsel %vm1148_vm1, %v1461_v9, %v1467_v23  ;;  %2071 = vmatpush.bf16.msra.mxu1 %v2637_v30  ;;  %v2634_v48 = vld [vmem:[#allocation11 + $0xc0] sm:$0xff]  ;;  %v2619_v9 = vld [vmem:[#allocation11 + $0x48] sm:$0xff] }
 0x56b   : > { %v1469_v14 = vpack.c.b16 %v1468_v21, %v1468_v21 }
 0x56c   : > { %2031 = vmatpush.bf16.msrb.mxu3 %v2614_v26 }
 0x56d   : > { %2301 = vmatmul.msk.bf16.vlgmr.msra.gmra.mxu2 %vm1151_vm2, %v1469_v14  ;;  %1713 = vmatpush.bf16.msrb.mxu0 %v2313_v51 }
 0x56e   : > { %2041 = vmatpush.bf16.msra.mxu2 %v2625_v61  ;;  %2072 = vmatpush.bf16.msra.mxu1 %v2636_v4 }
 0x570   : > { %2032 = vmatpush.bf16.msrb.mxu3 %v2613_v13 }
 0x571   : > { %2054 = vmatpush.bf16.msra.mxu0 %v2633_v19 }
 0x572   : > { %2042 = vmatpush.bf16.msra.mxu2 %v2624_v63  ;;  %2073 = vmatpush.bf16.msra.mxu1 %v2635_v12 }
 0x574   : > { %2033 = vmatpush.bf16.msrb.mxu3 %v2612_v10 }
 0x575   : > { %2055 = vmatpush.bf16.msra.mxu0 %v2632_v40 }
 0x576   : > { %2043 = vmatpush.bf16.msra.mxu2 %v2623_v1  ;;  %2074 = vmatpush.bf16.msra.mxu1 %v2634_v48 }
 0x578   : > { %2034 = vmatpush.bf16.msrb.mxu3 %v2611_v18 }
 0x579   : > { %2056 = vmatpush.bf16.msra.mxu0 %v2631_v28 }
 0x57a   : > { %2044 = vmatpush.bf16.msra.mxu2 %v2622_v7 }
 0x57c   : > { %2035 = vmatpush.bf16.msrb.mxu3 %v2610_v27 }
 0x57d   : > { %2057 = vmatpush.bf16.msra.mxu0 %v2630_v2 }
 0x57e   : > { %2045 = vmatpush.bf16.msra.mxu2 %v2621_v5 }
 0x581   : > { %2058 = vmatpush.bf16.msra.mxu0 %v2629_v3 }
 0x582   : > { %2046 = vmatpush.bf16.msra.mxu2 %v2620_v34 }
 0x585   : > { %2059 = vmatpush.bf16.msra.mxu0 %v2628_v6 }
 0x586   : > { %2047 = vmatpush.bf16.msra.mxu2 %v2619_v9 }
 0x589   : > { %2060 = vmatpush.bf16.msra.mxu0 %v2627_v8 }
 0x58a   : > { %2048 = vmatpush.bf16.msra.mxu2 %v2618_v31 }
 0x58d   : > { %2061 = vmatpush.bf16.msra.mxu0 %v2626_v54 }
 0x5f0   : > { %v1482_v20 = vpop.f32.mrf.mxu2 }
 0x5f1   : > { %v1483_v29 = vadd.f32 %v2765_v17, %v1482_v20 }
 0x5f3   : > { %v3694_v47 = vadd.f32 %v2816_v11, %v1483_v29 }
 0x5f5   : > { %v1487_v41 = vpack.c.bf16 %v3694_v47, %v3694_v47 }
 0x5f7   : > { %1688 = vmatmul.bf16.vlgmr.msra.gmra.mxu3 %v1487_v41  ;;  %1701 = vmatmul.bf16.vlgmr.msrb.gmra.mxu2 %v1487_v41 }
 0x5f8   : > { %1714 = vmatmul.bf16.vlgmr.msrb.gmra.mxu0 %v1487_v41  ;;  %1727 = vmatmul.bf16.vlgmr.msrb.gmra.mxu1 %v1487_v41  ;;  %v1484_v25 = vpop.f32.mrf.mxu2 }
 0x675   : > { %v1715_v23 = vpop.f32.mrf.mxu0  ;;  %v1728_v21 = vpop.f32.mrf.mxu1 }
 0x676   : > { %v1738_v14 = vmul.f32 0.044715, %v1715_v23  ;;  %v1739_v32 = vmul.f32 0.044715, %v1728_v21  ;;  %v1734_v62 = vmul.f32 0.5, %v1715_v23  ;;  %v1735_v20 = vmul.f32 0.5, %v1728_v21 }
 0x678   : > { %v1742_v16 = vmul.f32 %v1738_v14, %v1715_v23  ;;  %v1743_v22 = vmul.f32 %v1739_v32, %v1728_v21 }
 0x67a   : > { %v1746_v33 = vmul.f32 %v1742_v16, %v1715_v23  ;;  %v1747_v56 = vmul.f32 %v1743_v22, %v1728_v21  ;;  %v1689_v37 = vpop.f32.mrf.mxu3  ;;  %v1702_v55 = vpop.f32.mrf.mxu2 }
 0x67b   : > { %v1736_v43 = vmul.f32 0.044715, %v1689_v37  ;;  %v1737_v44 = vmul.f32 0.044715, %v1702_v55  ;;  %v1733_v15 = vmul.f32 0.5, %v1702_v55  ;;  %v1732_v36 = vmul.f32 0.5, %v1689_v37 }
 0x67c   : > { %v1750_v45 = vadd.f32 %v1746_v33, %v1715_v23  ;;  %v1751_v42 = vadd.f32 %v1747_v56, %v1728_v21 }
 0x67d   : > { %v1740_v46 = vmul.f32 %v1736_v43, %v1689_v37  ;;  %v1741_v49 = vmul.f32 %v1737_v44, %v1702_v55  ;;  %v1717_v52 = vpop.f32.mrf.mxu0  ;;  %v1730_v50 = vpop.f32.mrf.mxu1 }
 0x67e   : > { %v1754_v53 = vmul.f32 0.7978846, %v1750_v45  ;;  %v1755_v57 = vmul.f32 0.7978846, %v1751_v42 }
 0x67f   : > { %v1744_v39 = vmul.f32 %v1740_v46, %v1689_v37  ;;  %v1745_v58 = vmul.f32 %v1741_v49, %v1702_v55 }
 0x680   : > { %2808 = vtanh.f32 %v1754_v53 }
 0x681   : > { %2810 = vtanh.f32 %v1755_v57  ;;  %v1748_v51 = vadd.f32 %v1744_v39, %v1689_v37  ;;  %v1749_v59 = vadd.f32 %v1745_v58, %v1702_v55 }
 0x682   : > { %v1691_v19 = vpop.f32.mrf.mxu3  ;;  %v1704_v24 = vpop.f32.mrf.mxu2 }
 0x683   : > { %v1753_v38 = vmul.f32 0.7978846, %v1749_v59  ;;  %v1752_v60 = vmul.f32 0.7978846, %v1748_v51 }
 0x685   : > { %2812 = vtanh.f32 %v1753_v38 }
 0x686   : > { %v2809_v61 = vpop.eup %2808  ;;  %2814 = vtanh.f32 %v1752_v60 }
 0x687   : > { %v2811_v40 = vpop.eup %2810  ;;  %v1762_v17 = vadd.f32 1.0, %v2809_v61 }
 0x688   : > { %v1763_v29 = vadd.f32 1.0, %v2811_v40 }
 0x689   : > { %v1766_v11 = vmul.f32 %v1762_v17, %v1734_v62 }
 0x68a   : > { %v1767_v41 = vmul.f32 %v1763_v29, %v1735_v20 }
 0x68b   : > { %v2813_v25 = vpop.eup %2812  ;;  %v1770_v28 = vpack.c.bf16 %v1766_v11, %v1766_v11 }
 0x68c   : > { %v2815_v35 = vpop.eup %2814  ;;  %v1771_v63 = vpack.c.bf16 %v1767_v41, %v1767_v41  ;;  %v1761_v2 = vadd.f32 1.0, %v2813_v25 }
 0x68d   : > { %2062 = vmatmul.bf16.vlgmr.msra.gmra.mxu0 %v1770_v28  ;;  %v1760_v0 = vadd.f32 1.0, %v2815_v35 }
 0x68e   : > { %2075 = vmatmul.bf16.vlgmr.msra.gmra.mxu1 %v1771_v63  ;;  %v1765_v1 = vmul.f32 %v1761_v2, %v1733_v15 }
 0x68f   : > { %v1764_v3 = vmul.f32 %v1760_v0, %v1732_v36 }
 0x690   : > { %v1769_v30 = vpack.c.bf16 %v1765_v1, %v1765_v1 }
 0x691   : > { %v1768_v26 = vpack.c.bf16 %v1764_v3, %v1764_v3 }
 0x692   : > { %2049 = vmatmul.bf16.vlgmr.msra.gmra.mxu2 %v1769_v30 }
 0x693   : > { %2036 = vmatmul.bf16.vlgmr.msrb.gmra.mxu3 %v1768_v26 }
 0x70a   : > { %v2063_v7 = vpop.f32.mrf.mxu0 }
 0x70b   : > { %v2076_v6 = vpop.f32.mrf.mxu1 }
 0x712   : > { %v2065_v4 = vpop.f32.mrf.mxu0 }
 0x713   : > { %v2078_v13 = vpop.f32.mrf.mxu1 }
 0x715   : > { %v2050_v5 = vpop.f32.mrf.mxu2 }
 0x716   : > { %v2037_v8 = vpop.f32.mrf.mxu3 }
 0x717   : > { %v2051_v12 = vadd.f32 %v2050_v5, %v2037_v8 }
 0x719   : > { %v2064_v10 = vadd.f32 %v2063_v7, %v2051_v12 }
 0x71b   : > { %v2077_v34 = vadd.f32 %v2076_v6, %v2064_v10 }
 0x71d   : > { %v2080_v54 = vadd.f32 %v2077_v34, %v3694_v47  ;;  %v2052_v48 = vpop.f32.mrf.mxu2 }
 0x71e   : > { %v2039_v18 = vpop.f32.mrf.mxu3 }
 0x71f   : > { %2081 = vst [vmem:[%s513_s8] sm:$0xff] %v2080_v54 }
 0x720   : > { %3024 = shalt.err (!%p3021_p9)
}
 0x721   : > { %2664 = dma.vmem_to_hbm [thread:$0]  (%p3241_p13), %s2096_s19, 128, %s2098_s18, %s2083_s28  }
 0x722 PF: > { %s2109_s15 = sand.u32 1, %s3063_s21   ;;  %p3767_p10 = scmp.ge.s32.totalorder %s3075_s24, 2 }
 0x723   : > { %s2110_s14 = scalar_lea.sflag [#allocation4], %s2109_s15 }
 0x724   : > { %p2687_p11 = pnand %p3767_p10, %p3246_p4 }
 0x726   : > { %p2688_p0 = pneg %p2687_p11 }
 0x728   : > { %3058 = dma.done.wait (%p2688_p0), %s2110_s14, 128  }
 0x729   : > { %3060 = vsyncadd (%p2688_p0), %s2110_s14, 4294967168  ;;  %p28_p2 = scmp.ge.s32.totalorder %s3221_s30, 4   ;;  %s3768_s21 = smov %s3067_s22 }
 0x72a   : > { %s3769_s22 = smov %s3071_s23  ;;  %s3770_s23 = smov %s3233_s27 }
 0x72b   : > { %s3771_s24 = smov %s3221_s30  ;;  %30 = sbr.rel (!%p28_p2) target bundleno = 15 (0xf), region = 134 }
 0x730   :  { %2116 = vsyncpa [#allocation3], 1 }
 0x731   :  { %2118 = vsyncpa [#allocation3 + $0x1], 1 }
 0x732   :  { %2119 = vsyncpa [#allocation6], 1 }
 0x733   :  { %2120 = vsyncpa [#allocation9], 1 }
 0x734   :  { %2121 = vsyncpa [#allocation12], 1 }
 0x735   :  { %2122 = vsyncpa [#allocation4], 1 }
 0x736   :  { %2124 = vsyncpa [#allocation4 + $0x1], 1 }

</bundles_post_ra>
